<compile_context>
chip_gen: v5e
topology: v5e:2x2
jax: 0.10.0
libtpu: 0.0.40
codegen_flags: <defaults>
</compile_context>

<pallas_src>
import jax
import jax.numpy as jnp
from jax import lax
from jax.experimental import pallas as pl
from jax.experimental.pallas import tpu as pltpu

CONFIG = {"IM_SIZE": 28}

IM = CONFIG["IM_SIZE"]                                   # 28
S = IM                                                   # row stride of flattened buffers
H3 = IM - 6                                              # 22 : conv3 output H/W
OFFS = tuple(di * S + dj for di in range(3) for dj in range(3))  # 3x3 tap row offsets
MAX_OFF = OFFS[-1]                                       # 58

P = 744          # per-image row count (multiple of 8, >= 726 so tap chains stay in-image)
TAIL = 64        # zeroed guard rows after the last image in a tile (>= MAX_OFF)
B = 4            # images per grid step (batch tile); VMEM ~10 MB, safe on v5e/v6e/v7x
BP = B * P       # 2976 rows per grid step
CHUNK = 96       # rows per register-accumulated chunk (CHUNK | BP, ~12-vreg accumulator)
N_CHUNKS = BP // CHUNK                                   # 31

K1 = 16          # conv1 contraction width (9 taps zero-padded to 16)
C1, C2, C3 = 32, 64, 64
NCLASS = 10


# ----------------------------------------------------------------------------
# Fused conv stack kernel: conv1 -> relu -> conv2 -> relu -> conv3 -> relu
# ----------------------------------------------------------------------------
def _conv_stack_kernel(x_ref, w1_ref, b1_ref, w2_ref, b2_ref, w3_ref, b3_ref,
                       out_ref, buf1, buf2):
    # Guard rows past the last image must stay finite (zero): the garbage rows
    # of the last image read them, and the FC weight is zero on garbage rows.
    buf1[pl.ds(BP, TAIL), :] = jnp.zeros((TAIL, C1), jnp.float32)
    buf2[pl.ds(BP, TAIL), :] = jnp.zeros((TAIL, C2), jnp.float32)

    # conv1: K-fused (im2col built by the wrapper) -> one bf16 dot per chunk.
    def conv1_body(k, carry):
        base = pl.multiple_of(k * CHUNK, 8)
        lhs = x_ref[pl.ds(base, CHUNK), :].astype(jnp.bfloat16)        # (CHUNK, 16)
        acc = jnp.dot(lhs, w1_ref[...], preferred_element_type=jnp.float32)
        buf1[pl.ds(base, CHUNK), :] = jnp.maximum(acc + b1_ref[...], 0.0)
        return carry

    lax.fori_loop(0, N_CHUNKS, conv1_body, 0)

    # conv2 / conv3: 9 shifted taps, accumulated in registers, one store/chunk.
    def conv3x3(src_ref, w_ref, b_ref, dst_ref):
        def body(k, carry):
            base = pl.multiple_of(k * CHUNK, 8)
            acc = None
            for t, off in enumerate(OFFS):
                lhs = src_ref[pl.ds(base + off, CHUNK), :].astype(jnp.bfloat16)
                part = jnp.dot(lhs, w_ref[t], preferred_element_type=jnp.float32)
                acc = part if acc is None else acc + part
            dst_ref[pl.ds(base, CHUNK), :] = jnp.maximum(acc + b_ref[...], 0.0)
            return carry

        lax.fori_loop(0, N_CHUNKS, body, 0)

    conv3x3(buf1, w2_ref, b2_ref, buf2)      # conv2 -> (BP, 64) f32 in buf2
    conv3x3(buf2, w3_ref, b3_ref, out_ref)   # conv3 -> (BP, 64) f32 output block


# ----------------------------------------------------------------------------
# Forward wrapper: im2col for conv1, one pallas_call, then the FC as one XLA
# batch matmul on the activation slab (zero FC weight masks garbage rows).
# ----------------------------------------------------------------------------
@jax.jit
def image_classifier_forward(x_nchw, prepared):
    w1k, b1p, w2k, b2p, w3k, b3p, fcw, fcb = prepared
    n = x_nchw.shape[0]
    n_pad = -(-n // B) * B

    x = x_nchw.reshape(n, IM * IM).astype(jnp.float32)
    if n_pad > n:
        x = jnp.pad(x, ((0, n_pad - n), (0, 0)))
    x = jnp.pad(x, ((0, 0), (0, P + TAIL - IM * IM)))                 # (n_pad, 808)
    # conv1 im2col: x9[n, r, t] = x[n, r + off_t]   (tiny; K-fuses conv1)
    x9 = jnp.stack([x[:, off:off + P] for off in OFFS], axis=-1)      # (n_pad, P, 9)
    x9 = jnp.pad(x9, ((0, 0), (0, 0), (0, K1 - len(OFFS))))           # (n_pad, P, 16)
    x9 = x9.reshape(n_pad * P, K1)

    const2 = lambda i: (0, 0)
    const3 = lambda i: (0, 0, 0)

    acts = pl.pallas_call(
        _conv_stack_kernel,
        out_shape=jax.ShapeDtypeStruct((n_pad * P, C3), jnp.float32),
        grid_spec=pltpu.PrefetchScalarGridSpec(
            num_scalar_prefetch=0,
            grid=(n_pad // B,),
            in_specs=[
                pl.BlockSpec((BP, K1), lambda i: (i, 0)),             # im2col input
                pl.BlockSpec((K1, C1), const2),                       # w1 (K-fused)
                pl.BlockSpec((1, C1), const2),                        # b1
                pl.BlockSpec((9, C1, C2), const3),                    # w2
                pl.BlockSpec((1, C2), const2),                        # b2
                pl.BlockSpec((9, C2, C3), const3),                    # w3
                pl.BlockSpec((1, C3), const2),                        # b3
            ],
            out_specs=pl.BlockSpec((BP, C3), lambda i: (i, 0)),
            scratch_shapes=[
                pltpu.VMEM((BP + TAIL, C1), jnp.float32),
                pltpu.VMEM((BP + TAIL, C2), jnp.float32),
            ],
        ),
        compiler_params=pltpu.CompilerParams(
            dimension_semantics=("parallel",),
            vmem_limit_bytes=40 * 1024 * 1024,
        ),
    )(x9, w1k, b1p, w2k, b2p, w3k, b3p)

    # fc: one XLA matmul over the whole batch; fcw is zero on padded rows.
    logits = jnp.dot(acts.reshape(n_pad, P * C3), fcw,
                     preferred_element_type=jnp.float32) + fcb
    return logits[:n]


# ----------------------------------------------------------------------------
# One-time weight repack into the kernel's layouts (not in the hot path)
# ----------------------------------------------------------------------------
def prepare_params(params):
    (w1, b1), (w2, b2), (w3, b3), (wfc, bfc) = params

    def conv_w(w):
        cout, cin, kh, kw = w.shape
        # (Cout, Cin, 3, 3) -> (9, Cin, Cout), tap index t = di*3 + dj
        return jnp.transpose(w, (2, 3, 1, 0)).reshape(kh * kw, cin, cout)

    # conv1: single input channel -> K-fused (16, 32) weight (taps padded 9->16)
    w1k = conv_w(w1).reshape(9, C1)
    w1k = jnp.pad(w1k, ((0, K1 - 9), (0, 0))).astype(jnp.bfloat16)
    w2k = conv_w(w2).astype(jnp.bfloat16)                  # (9, 32, 64)
    w3k = conv_w(w3).astype(jnp.bfloat16)                  # (9, 64, 64)
    b1p = b1.reshape(1, C1).astype(jnp.float32)
    b2p = b2.reshape(1, C2).astype(jnp.float32)
    b3p = b3.reshape(1, C3).astype(jnp.float32)

    # fc weight: torch flatten order is (c, i, j); kernel rows are r = i*28+j
    # with channel c minor -> build (P*64, 10), zeros on padded/garbage rows.
    wf = wfc.reshape(NCLASS, C3, H3, H3)                   # (10, c, i, j)
    wf = jnp.transpose(wf, (2, 3, 1, 0))                   # (i, j, c, 10)
    wf = jnp.pad(wf, ((0, IM - H3), (0, IM - H3), (0, 0), (0, 0)))   # (28,28,64,10)
    wf = wf.reshape(IM * IM, C3, NCLASS)[:P]               # (744, 64, 10)
    fcw = wf.reshape(P * C3, NCLASS).astype(jnp.float32)
    fcb = bfc.reshape(1, NCLASS).astype(jnp.float32)
    return (w1k, b1p, w2k, b2p, w3k, b3p, fcw, fcb)


# ----------------------------------------------------------------------------
# Deterministic parameter init (PyTorch-style shapes/bounds, synthetic values)
# ----------------------------------------------------------------------------
def init_params(key):
    ks = jax.random.split(key, 8)

    def uinit(k, shape, fan_in):
        bound = 1.0 / (fan_in ** 0.5)
        return jax.random.uniform(k, shape, jnp.float32, -bound, bound)

    im = CONFIG["IM_SIZE"]
    w1 = uinit(ks[0], (32, 1, 3, 3), 1 * 3 * 3)
    b1 = uinit(ks[1], (32,), 1 * 3 * 3)
    w2 = uinit(ks[2], (64, 32, 3, 3), 32 * 3 * 3)
    b2 = uinit(ks[3], (64,), 32 * 3 * 3)
    w3 = uinit(ks[4], (64, 64, 3, 3), 64 * 3 * 3)
    b3 = uinit(ks[5], (64,), 64 * 3 * 3)
    fan_fc = 64 * (im - 6) * (im - 6)
    wfc = uinit(ks[6], (10, fan_fc), fan_fc)
    bfc = uinit(ks[7], (10,), fan_fc)
    return (w1, b1), (w2, b2), (w3, b3), (wfc, bfc)


# ----------------------------------------------------------------------------
# Pure-JAX reference (XLA conv) for a sanity check
# ----------------------------------------------------------------------------
def reference_forward(x_nchw, params):
    (w1, b1), (w2, b2), (w3, b3), (wfc, bfc) = params
    y = x_nchw
    for (w, b) in [(w1, b1), (w2, b2), (w3, b3)]:
        y = lax.conv_general_dilated(
            y, w, window_strides=(1, 1), padding="VALID",
            dimension_numbers=("NCHW", "OIHW", "NCHW"),
        )
        y = jnp.maximum(y + b[None, :, None, None], 0.0)
    flat = y.reshape(y.shape[0], -1)
    return flat @ wfc.T + bfc[None, :]


if __name__ == "__main__":
    key = jax.random.PRNGKey(0)
    k_params, k_x = jax.random.split(key)

    params = init_params(k_params)
    prepared = prepare_params(params)        # one-time weight repack

    x = jax.random.normal(
        k_x, (2, 1, CONFIG["IM_SIZE"], CONFIG["IM_SIZE"]), dtype=jnp.float32)

    out = jax.block_until_ready(image_classifier_forward(x, prepared))
    assert out.shape == (2, 10) and out.dtype == jnp.float32

    ref = jax.block_until_ready(reference_forward(x, params))
    # bf16 is used only at the MXU operand boundary (weights + LHS casts);
    # all accumulation stays f32, so the loosened tolerance is modest.
    assert jnp.allclose(out, ref, rtol=2e-2, atol=5e-3), (out, ref)

    print("KERNEL_OK")
</pallas_src>

<mosaic_0001>
module attributes {stable_mosaic.version = 11 : i64} {
  func.func @_conv_stack_kernel(%arg0: i32, %arg1: memref<2976x16xf32, #tpu.memory_space<vmem>>, %arg2: memref<16x32xbf16, #tpu.memory_space<vmem>>, %arg3: memref<1x32xf32, #tpu.memory_space<vmem>>, %arg4: memref<9x32x64xbf16, #tpu.memory_space<vmem>>, %arg5: memref<1x64xf32, #tpu.memory_space<vmem>>, %arg6: memref<9x64x64xbf16, #tpu.memory_space<vmem>>, %arg7: memref<1x64xf32, #tpu.memory_space<vmem>>, %arg8: memref<2976x64xf32, #tpu.memory_space<vmem>>, %arg9: memref<3040x32xf32, #tpu.memory_space<vmem>>, %arg10: memref<3040x64xf32, #tpu.memory_space<vmem>>) attributes {dimension_semantics = [#tpu.dimension_semantics<parallel>], iteration_bounds = array<i64: 1>, scalar_prefetch = 0 : i64, scratch_operands = 2 : i64, tpu.core_type = #tpu.core_type<tc>, window_params = [{transform_indices = @transform_0, window_bounds = array<i64: 2976, 16>}, {pipeline_mode = #tpu.pipeline_mode<synchronous>, transform_indices = @transform_1, window_bounds = array<i64: 16, 32>}, {pipeline_mode = #tpu.pipeline_mode<synchronous>, transform_indices = @transform_2, window_bounds = array<i64: 1, 32>}, {pipeline_mode = #tpu.pipeline_mode<synchronous>, transform_indices = @transform_3, window_bounds = array<i64: 9, 32, 64>}, {pipeline_mode = #tpu.pipeline_mode<synchronous>, transform_indices = @transform_4, window_bounds = array<i64: 1, 64>}, {pipeline_mode = #tpu.pipeline_mode<synchronous>, transform_indices = @transform_5, window_bounds = array<i64: 9, 64, 64>}, {pipeline_mode = #tpu.pipeline_mode<synchronous>, transform_indices = @transform_6, window_bounds = array<i64: 1, 64>}, {transform_indices = @transform_7, window_bounds = array<i64: 2976, 64>}]} {
    %cst = arith.constant 0.000000e+00 : f32
    %0 = vector.broadcast %cst : f32 to vector<64x32xf32>
    %c2976 = arith.constant 2976 : index
    %c0 = arith.constant 0 : index
    %1 = vector.load %arg9[%c2976, %c0] : memref<3040x32xf32, #tpu.memory_space<vmem>>, vector<64x32xf32>
    tpu.vector_store %arg9[%c2976, %c0], %0 {strides = array<i32>} : memref<3040x32xf32, #tpu.memory_space<vmem>>, vector<64x32xf32>,
    %cst_0 = arith.constant 0.000000e+00 : f32
    %2 = vector.broadcast %cst_0 : f32 to vector<64x64xf32>
    %c2976_1 = arith.constant 2976 : index
    %c0_2 = arith.constant 0 : index
    %3 = vector.load %arg10[%c2976_1, %c0_2] : memref<3040x64xf32, #tpu.memory_space<vmem>>, vector<64x64xf32>
    tpu.vector_store %arg10[%c2976_1, %c0_2], %2 {strides = array<i32>} : memref<3040x64xf32, #tpu.memory_space<vmem>>, vector<64x64xf32>,
    %c0_i32 = arith.constant 0 : i32
    %c31_i32 = arith.constant 31 : i32
    %4 = arith.addi %c0_i32, %c31_i32 : i32
    %c1_i32 = arith.constant 1 : i32
    scf.for %arg11 = %c0_i32 to %4 step %c1_i32  : i32 {
      %c96_i32 = arith.constant 96 : i32
      %7 = arith.muli %arg11, %c96_i32 : i32
      %8 = tpu.assume_multiple %7, 8 : i32
      %9 = arith.index_cast %8 : i32 to index
      %c0_12 = arith.constant 0 : index
      %10 = vector.load %arg1[%9, %c0_12] : memref<2976x16xf32, #tpu.memory_space<vmem>>, vector<96x16xf32>
      %11 = arith.truncf %10 : vector<96x16xf32> to vector<96x16xbf16>
      %c0_13 = arith.constant 0 : index
      %c0_14 = arith.constant 0 : index
      %12 = vector.load %arg2[%c0_13, %c0_14] : memref<16x32xbf16, #tpu.memory_space<vmem>>, vector<16x32xbf16>
      %cst_15 = arith.constant dense<0.000000e+00> : vector<96x32xf32>
      %13 = tpu.matmul %11, %12, %cst_15 {dimension_numbers = #tpu.dot_dimension_numbers<[1], [0], [0], [1], [0, 0, 1, 1], [], []>} : vector<96x16xbf16>, vector<16x32xbf16>, vector<96x32xf32> -> vector<96x32xf32>
      %c0_16 = arith.constant 0 : index
      %c0_17 = arith.constant 0 : index
      %14 = vector.load %arg3[%c0_16, %c0_17] : memref<1x32xf32, #tpu.memory_space<vmem>>, vector<1x32xf32>
      %15 = vector.broadcast %14 : vector<1x32xf32> to vector<96x32xf32>
      %16 = arith.addf %13, %15 : vector<96x32xf32>
      %cst_18 = arith.constant 0.000000e+00 : f32
      %17 = vector.broadcast %cst_18 : f32 to vector<96x32xf32>
      %18 = arith.maximumf %16, %17 : vector<96x32xf32>
      %19 = arith.index_cast %8 : i32 to index
      %c0_19 = arith.constant 0 : index
      %20 = vector.load %arg9[%19, %c0_19] : memref<3040x32xf32, #tpu.memory_space<vmem>>, vector<96x32xf32>
      tpu.vector_store %arg9[%19, %c0_19], %18 {strides = array<i32>} : memref<3040x32xf32, #tpu.memory_space<vmem>>, vector<96x32xf32>,
    }
    %c31_i32_3 = arith.constant 31 : i32
    %c0_i32_4 = arith.constant 0 : i32
    %c31_i32_5 = arith.constant 31 : i32
    %5 = arith.addi %c0_i32_4, %c31_i32_5 : i32
    %c1_i32_6 = arith.constant 1 : i32
    scf.for %arg11 = %c0_i32_4 to %5 step %c1_i32_6  : i32 {
      %c96_i32 = arith.constant 96 : i32
      %7 = arith.muli %arg11, %c96_i32 : i32
      %8 = tpu.assume_multiple %7, 8 : i32
      %c0_i32_12 = arith.constant 0 : i32
      %9 = arith.addi %8, %c0_i32_12 : i32
      %10 = arith.index_cast %9 : i32 to index
      %c0_13 = arith.constant 0 : index
      %11 = vector.load %arg9[%10, %c0_13] : memref<3040x32xf32, #tpu.memory_space<vmem>>, vector<96x32xf32>
      %12 = arith.truncf %11 : vector<96x32xf32> to vector<96x32xbf16>
      %c0_14 = arith.constant 0 : index
      %c0_15 = arith.constant 0 : index
      %c0_16 = arith.constant 0 : index
      %13 = vector.load %arg4[%c0_14, %c0_15, %c0_16] : memref<9x32x64xbf16, #tpu.memory_space<vmem>>, vector<1x32x64xbf16>
      %14 = vector.shape_cast %13 : vector<1x32x64xbf16> to vector<32x64xbf16>
      %cst_17 = arith.constant dense<0.000000e+00> : vector<96x64xf32>
      %15 = tpu.matmul %12, %14, %cst_17 {dimension_numbers = #tpu.dot_dimension_numbers<[1], [0], [0], [1], [0, 0, 1, 1], [], []>} : vector<96x32xbf16>, vector<32x64xbf16>, vector<96x64xf32> -> vector<96x64xf32>
      %c1_i32_18 = arith.constant 1 : i32
      %16 = arith.addi %8, %c1_i32_18 : i32
      %17 = arith.index_cast %16 : i32 to index
      %c0_19 = arith.constant 0 : index
      %18 = vector.load %arg9[%17, %c0_19] : memref<3040x32xf32, #tpu.memory_space<vmem>>, vector<96x32xf32>
      %19 = arith.truncf %18 : vector<96x32xf32> to vector<96x32xbf16>
      %c1 = arith.constant 1 : index
      %c0_20 = arith.constant 0 : index
      %c0_21 = arith.constant 0 : index
      %20 = vector.load %arg4[%c1, %c0_20, %c0_21] : memref<9x32x64xbf16, #tpu.memory_space<vmem>>, vector<1x32x64xbf16>
      %21 = vector.shape_cast %20 : vector<1x32x64xbf16> to vector<32x64xbf16>
      %cst_22 = arith.constant dense<0.000000e+00> : vector<96x64xf32>
      %22 = tpu.matmul %19, %21, %cst_22 {dimension_numbers = #tpu.dot_dimension_numbers<[1], [0], [0], [1], [0, 0, 1, 1], [], []>} : vector<96x32xbf16>, vector<32x64xbf16>, vector<96x64xf32> -> vector<96x64xf32>
      %23 = arith.addf %15, %22 : vector<96x64xf32>
      %c2_i32 = arith.constant 2 : i32
      %24 = arith.addi %8, %c2_i32 : i32
      %25 = arith.index_cast %24 : i32 to index
      %c0_23 = arith.constant 0 : index
      %26 = vector.load %arg9[%25, %c0_23] : memref<3040x32xf32, #tpu.memory_space<vmem>>, vector<96x32xf32>
      %27 = arith.truncf %26 : vector<96x32xf32> to vector<96x32xbf16>
      %c2 = arith.constant 2 : index
      %c0_24 = arith.constant 0 : index
      %c0_25 = arith.constant 0 : index
      %28 = vector.load %arg4[%c2, %c0_24, %c0_25] : memref<9x32x64xbf16, #tpu.memory_space<vmem>>, vector<1x32x64xbf16>
      %29 = vector.shape_cast %28 : vector<1x32x64xbf16> to vector<32x64xbf16>
      %cst_26 = arith.constant dense<0.000000e+00> : vector<96x64xf32>
      %30 = tpu.matmul %27, %29, %cst_26 {dimension_numbers = #tpu.dot_dimension_numbers<[1], [0], [0], [1], [0, 0, 1, 1], [], []>} : vector<96x32xbf16>, vector<32x64xbf16>, vector<96x64xf32> -> vector<96x64xf32>
      %31 = arith.addf %23, %30 : vector<96x64xf32>
      %c28_i32 = arith.constant 28 : i32
      %32 = arith.addi %8, %c28_i32 : i32
      %33 = arith.index_cast %32 : i32 to index
      %c0_27 = arith.constant 0 : index
      %34 = vector.load %arg9[%33, %c0_27] : memref<3040x32xf32, #tpu.memory_space<vmem>>, vector<96x32xf32>
      %35 = arith.truncf %34 : vector<96x32xf32> to vector<96x32xbf16>
      %c3 = arith.constant 3 : index
      %c0_28 = arith.constant 0 : index
      %c0_29 = arith.constant 0 : index
      %36 = vector.load %arg4[%c3, %c0_28, %c0_29] : memref<9x32x64xbf16, #tpu.memory_space<vmem>>, vector<1x32x64xbf16>
      %37 = vector.shape_cast %36 : vector<1x32x64xbf16> to vector<32x64xbf16>
      %cst_30 = arith.constant dense<0.000000e+00> : vector<96x64xf32>
      %38 = tpu.matmul %35, %37, %cst_30 {dimension_numbers = #tpu.dot_dimension_numbers<[1], [0], [0], [1], [0, 0, 1, 1], [], []>} : vector<96x32xbf16>, vector<32x64xbf16>, vector<96x64xf32> -> vector<96x64xf32>
      %39 = arith.addf %31, %38 : vector<96x64xf32>
      %c29_i32 = arith.constant 29 : i32
      %40 = arith.addi %8, %c29_i32 : i32
      %41 = arith.index_cast %40 : i32 to index
      %c0_31 = arith.constant 0 : index
      %42 = vector.load %arg9[%41, %c0_31] : memref<3040x32xf32, #tpu.memory_space<vmem>>, vector<96x32xf32>
      %43 = arith.truncf %42 : vector<96x32xf32> to vector<96x32xbf16>
      %c4 = arith.constant 4 : index
      %c0_32 = arith.constant 0 : index
      %c0_33 = arith.constant 0 : index
      %44 = vector.load %arg4[%c4, %c0_32, %c0_33] : memref<9x32x64xbf16, #tpu.memory_space<vmem>>, vector<1x32x64xbf16>
      %45 = vector.shape_cast %44 : vector<1x32x64xbf16> to vector<32x64xbf16>
      %cst_34 = arith.constant dense<0.000000e+00> : vector<96x64xf32>
      %46 = tpu.matmul %43, %45, %cst_34 {dimension_numbers = #tpu.dot_dimension_numbers<[1], [0], [0], [1], [0, 0, 1, 1], [], []>} : vector<96x32xbf16>, vector<32x64xbf16>, vector<96x64xf32> -> vector<96x64xf32>
      %47 = arith.addf %39, %46 : vector<96x64xf32>
      %c30_i32 = arith.constant 30 : i32
      %48 = arith.addi %8, %c30_i32 : i32
      %49 = arith.index_cast %48 : i32 to index
      %c0_35 = arith.constant 0 : index
      %50 = vector.load %arg9[%49, %c0_35] : memref<3040x32xf32, #tpu.memory_space<vmem>>, vector<96x32xf32>
      %51 = arith.truncf %50 : vector<96x32xf32> to vector<96x32xbf16>
      %c5 = arith.constant 5 : index
      %c0_36 = arith.constant 0 : index
      %c0_37 = arith.constant 0 : index
      %52 = vector.load %arg4[%c5, %c0_36, %c0_37] : memref<9x32x64xbf16, #tpu.memory_space<vmem>>, vector<1x32x64xbf16>
      %53 = vector.shape_cast %52 : vector<1x32x64xbf16> to vector<32x64xbf16>
      %cst_38 = arith.constant dense<0.000000e+00> : vector<96x64xf32>
      %54 = tpu.matmul %51, %53, %cst_38 {dimension_numbers = #tpu.dot_dimension_numbers<[1], [0], [0], [1], [0, 0, 1, 1], [], []>} : vector<96x32xbf16>, vector<32x64xbf16>, vector<96x64xf32> -> vector<96x64xf32>
      %55 = arith.addf %47, %54 : vector<96x64xf32>
      %c56_i32 = arith.constant 56 : i32
      %56 = arith.addi %8, %c56_i32 : i32
      %57 = arith.index_cast %56 : i32 to index
      %c0_39 = arith.constant 0 : index
      %58 = vector.load %arg9[%57, %c0_39] : memref<3040x32xf32, #tpu.memory_space<vmem>>, vector<96x32xf32>
      %59 = arith.truncf %58 : vector<96x32xf32> to vector<96x32xbf16>
      %c6 = arith.constant 6 : index
      %c0_40 = arith.constant 0 : index
      %c0_41 = arith.constant 0 : index
      %60 = vector.load %arg4[%c6, %c0_40, %c0_41] : memref<9x32x64xbf16, #tpu.memory_space<vmem>>, vector<1x32x64xbf16>
      %61 = vector.shape_cast %60 : vector<1x32x64xbf16> to vector<32x64xbf16>
      %cst_42 = arith.constant dense<0.000000e+00> : vector<96x64xf32>
      %62 = tpu.matmul %59, %61, %cst_42 {dimension_numbers = #tpu.dot_dimension_numbers<[1], [0], [0], [1], [0, 0, 1, 1], [], []>} : vector<96x32xbf16>, vector<32x64xbf16>, vector<96x64xf32> -> vector<96x64xf32>
      %63 = arith.addf %55, %62 : vector<96x64xf32>
      %c57_i32 = arith.constant 57 : i32
      %64 = arith.addi %8, %c57_i32 : i32
      %65 = arith.index_cast %64 : i32 to index
      %c0_43 = arith.constant 0 : index
      %66 = vector.load %arg9[%65, %c0_43] : memref<3040x32xf32, #tpu.memory_space<vmem>>, vector<96x32xf32>
      %67 = arith.truncf %66 : vector<96x32xf32> to vector<96x32xbf16>
      %c7 = arith.constant 7 : index
      %c0_44 = arith.constant 0 : index
      %c0_45 = arith.constant 0 : index
      %68 = vector.load %arg4[%c7, %c0_44, %c0_45] : memref<9x32x64xbf16, #tpu.memory_space<vmem>>, vector<1x32x64xbf16>
      %69 = vector.shape_cast %68 : vector<1x32x64xbf16> to vector<32x64xbf16>
      %cst_46 = arith.constant dense<0.000000e+00> : vector<96x64xf32>
      %70 = tpu.matmul %67, %69, %cst_46 {dimension_numbers = #tpu.dot_dimension_numbers<[1], [0], [0], [1], [0, 0, 1, 1], [], []>} : vector<96x32xbf16>, vector<32x64xbf16>, vector<96x64xf32> -> vector<96x64xf32>
      %71 = arith.addf %63, %70 : vector<96x64xf32>
      %c58_i32 = arith.constant 58 : i32
      %72 = arith.addi %8, %c58_i32 : i32
      %73 = arith.index_cast %72 : i32 to index
      %c0_47 = arith.constant 0 : index
      %74 = vector.load %arg9[%73, %c0_47] : memref<3040x32xf32, #tpu.memory_space<vmem>>, vector<96x32xf32>
      %75 = arith.truncf %74 : vector<96x32xf32> to vector<96x32xbf16>
      %c8 = arith.constant 8 : index
      %c0_48 = arith.constant 0 : index
      %c0_49 = arith.constant 0 : index
      %76 = vector.load %arg4[%c8, %c0_48, %c0_49] : memref<9x32x64xbf16, #tpu.memory_space<vmem>>, vector<1x32x64xbf16>
      %77 = vector.shape_cast %76 : vector<1x32x64xbf16> to vector<32x64xbf16>
      %cst_50 = arith.constant dense<0.000000e+00> : vector<96x64xf32>
      %78 = tpu.matmul %75, %77, %cst_50 {dimension_numbers = #tpu.dot_dimension_numbers<[1], [0], [0], [1], [0, 0, 1, 1], [], []>} : vector<96x32xbf16>, vector<32x64xbf16>, vector<96x64xf32> -> vector<96x64xf32>
      %79 = arith.addf %71, %78 : vector<96x64xf32>
      %c0_51 = arith.constant 0 : index
      %c0_52 = arith.constant 0 : index
      %80 = vector.load %arg5[%c0_51, %c0_52] : memref<1x64xf32, #tpu.memory_space<vmem>>, vector<1x64xf32>
      %81 = vector.broadcast %80 : vector<1x64xf32> to vector<96x64xf32>
      %82 = arith.addf %79, %81 : vector<96x64xf32>
      %cst_53 = arith.constant 0.000000e+00 : f32
      %83 = vector.broadcast %cst_53 : f32 to vector<96x64xf32>
      %84 = arith.maximumf %82, %83 : vector<96x64xf32>
      %85 = arith.index_cast %8 : i32 to index
      %c0_54 = arith.constant 0 : index
      %86 = vector.load %arg10[%85, %c0_54] : memref<3040x64xf32, #tpu.memory_space<vmem>>, vector<96x64xf32>
      tpu.vector_store %arg10[%85, %c0_54], %84 {strides = array<i32>} : memref<3040x64xf32, #tpu.memory_space<vmem>>, vector<96x64xf32>,
    }
    %c31_i32_7 = arith.constant 31 : i32
    %c0_i32_8 = arith.constant 0 : i32
    %c31_i32_9 = arith.constant 31 : i32
    %6 = arith.addi %c0_i32_8, %c31_i32_9 : i32
    %c1_i32_10 = arith.constant 1 : i32
    scf.for %arg11 = %c0_i32_8 to %6 step %c1_i32_10  : i32 {
      %c96_i32 = arith.constant 96 : i32
      %7 = arith.muli %arg11, %c96_i32 : i32
      %8 = tpu.assume_multiple %7, 8 : i32
      %c0_i32_12 = arith.constant 0 : i32
      %9 = arith.addi %8, %c0_i32_12 : i32
      %10 = arith.index_cast %9 : i32 to index
      %c0_13 = arith.constant 0 : index
      %11 = vector.load %arg10[%10, %c0_13] : memref<3040x64xf32, #tpu.memory_space<vmem>>, vector<96x64xf32>
      %12 = arith.truncf %11 : vector<96x64xf32> to vector<96x64xbf16>
      %c0_14 = arith.constant 0 : index
      %c0_15 = arith.constant 0 : index
      %c0_16 = arith.constant 0 : index
      %13 = vector.load %arg6[%c0_14, %c0_15, %c0_16] : memref<9x64x64xbf16, #tpu.memory_space<vmem>>, vector<1x64x64xbf16>
      %14 = vector.shape_cast %13 : vector<1x64x64xbf16> to vector<64x64xbf16>
      %cst_17 = arith.constant dense<0.000000e+00> : vector<96x64xf32>
      %15 = tpu.matmul %12, %14, %cst_17 {dimension_numbers = #tpu.dot_dimension_numbers<[1], [0], [0], [1], [0, 0, 1, 1], [], []>} : vector<96x64xbf16>, vector<64x64xbf16>, vector<96x64xf32> -> vector<96x64xf32>
      %c1_i32_18 = arith.constant 1 : i32
      %16 = arith.addi %8, %c1_i32_18 : i32
      %17 = arith.index_cast %16 : i32 to index
      %c0_19 = arith.constant 0 : index
      %18 = vector.load %arg10[%17, %c0_19] : memref<3040x64xf32, #tpu.memory_space<vmem>>, vector<96x64xf32>
      %19 = arith.truncf %18 : vector<96x64xf32> to vector<96x64xbf16>
      %c1 = arith.constant 1 : index
      %c0_20 = arith.constant 0 : index
      %c0_21 = arith.constant 0 : index
      %20 = vector.load %arg6[%c1, %c0_20, %c0_21] : memref<9x64x64xbf16, #tpu.memory_space<vmem>>, vector<1x64x64xbf16>
      %21 = vector.shape_cast %20 : vector<1x64x64xbf16> to vector<64x64xbf16>
      %cst_22 = arith.constant dense<0.000000e+00> : vector<96x64xf32>
      %22 = tpu.matmul %19, %21, %cst_22 {dimension_numbers = #tpu.dot_dimension_numbers<[1], [0], [0], [1], [0, 0, 1, 1], [], []>} : vector<96x64xbf16>, vector<64x64xbf16>, vector<96x64xf32> -> vector<96x64xf32>
      %23 = arith.addf %15, %22 : vector<96x64xf32>
      %c2_i32 = arith.constant 2 : i32
      %24 = arith.addi %8, %c2_i32 : i32
      %25 = arith.index_cast %24 : i32 to index
      %c0_23 = arith.constant 0 : index
      %26 = vector.load %arg10[%25, %c0_23] : memref<3040x64xf32, #tpu.memory_space<vmem>>, vector<96x64xf32>
      %27 = arith.truncf %26 : vector<96x64xf32> to vector<96x64xbf16>
      %c2 = arith.constant 2 : index
      %c0_24 = arith.constant 0 : index
      %c0_25 = arith.constant 0 : index
      %28 = vector.load %arg6[%c2, %c0_24, %c0_25] : memref<9x64x64xbf16, #tpu.memory_space<vmem>>, vector<1x64x64xbf16>
      %29 = vector.shape_cast %28 : vector<1x64x64xbf16> to vector<64x64xbf16>
      %cst_26 = arith.constant dense<0.000000e+00> : vector<96x64xf32>
      %30 = tpu.matmul %27, %29, %cst_26 {dimension_numbers = #tpu.dot_dimension_numbers<[1], [0], [0], [1], [0, 0, 1, 1], [], []>} : vector<96x64xbf16>, vector<64x64xbf16>, vector<96x64xf32> -> vector<96x64xf32>
      %31 = arith.addf %23, %30 : vector<96x64xf32>
      %c28_i32 = arith.constant 28 : i32
      %32 = arith.addi %8, %c28_i32 : i32
      %33 = arith.index_cast %32 : i32 to index
      %c0_27 = arith.constant 0 : index
      %34 = vector.load %arg10[%33, %c0_27] : memref<3040x64xf32, #tpu.memory_space<vmem>>, vector<96x64xf32>
      %35 = arith.truncf %34 : vector<96x64xf32> to vector<96x64xbf16>
      %c3 = arith.constant 3 : index
      %c0_28 = arith.constant 0 : index
      %c0_29 = arith.constant 0 : index
      %36 = vector.load %arg6[%c3, %c0_28, %c0_29] : memref<9x64x64xbf16, #tpu.memory_space<vmem>>, vector<1x64x64xbf16>
      %37 = vector.shape_cast %36 : vector<1x64x64xbf16> to vector<64x64xbf16>
      %cst_30 = arith.constant dense<0.000000e+00> : vector<96x64xf32>
      %38 = tpu.matmul %35, %37, %cst_30 {dimension_numbers = #tpu.dot_dimension_numbers<[1], [0], [0], [1], [0, 0, 1, 1], [], []>} : vector<96x64xbf16>, vector<64x64xbf16>, vector<96x64xf32> -> vector<96x64xf32>
      %39 = arith.addf %31, %38 : vector<96x64xf32>
      %c29_i32 = arith.constant 29 : i32
      %40 = arith.addi %8, %c29_i32 : i32
      %41 = arith.index_cast %40 : i32 to index
      %c0_31 = arith.constant 0 : index
      %42 = vector.load %arg10[%41, %c0_31] : memref<3040x64xf32, #tpu.memory_space<vmem>>, vector<96x64xf32>
      %43 = arith.truncf %42 : vector<96x64xf32> to vector<96x64xbf16>
      %c4 = arith.constant 4 : index
      %c0_32 = arith.constant 0 : index
      %c0_33 = arith.constant 0 : index
      %44 = vector.load %arg6[%c4, %c0_32, %c0_33] : memref<9x64x64xbf16, #tpu.memory_space<vmem>>, vector<1x64x64xbf16>
      %45 = vector.shape_cast %44 : vector<1x64x64xbf16> to vector<64x64xbf16>
      %cst_34 = arith.constant dense<0.000000e+00> : vector<96x64xf32>
      %46 = tpu.matmul %43, %45, %cst_34 {dimension_numbers = #tpu.dot_dimension_numbers<[1], [0], [0], [1], [0, 0, 1, 1], [], []>} : vector<96x64xbf16>, vector<64x64xbf16>, vector<96x64xf32> -> vector<96x64xf32>
      %47 = arith.addf %39, %46 : vector<96x64xf32>
      %c30_i32 = arith.constant 30 : i32
      %48 = arith.addi %8, %c30_i32 : i32
      %49 = arith.index_cast %48 : i32 to index
      %c0_35 = arith.constant 0 : index
      %50 = vector.load %arg10[%49, %c0_35] : memref<3040x64xf32, #tpu.memory_space<vmem>>, vector<96x64xf32>
      %51 = arith.truncf %50 : vector<96x64xf32> to vector<96x64xbf16>
      %c5 = arith.constant 5 : index
      %c0_36 = arith.constant 0 : index
      %c0_37 = arith.constant 0 : index
      %52 = vector.load %arg6[%c5, %c0_36, %c0_37] : memref<9x64x64xbf16, #tpu.memory_space<vmem>>, vector<1x64x64xbf16>
      %53 = vector.shape_cast %52 : vector<1x64x64xbf16> to vector<64x64xbf16>
      %cst_38 = arith.constant dense<0.000000e+00> : vector<96x64xf32>
      %54 = tpu.matmul %51, %53, %cst_38 {dimension_numbers = #tpu.dot_dimension_numbers<[1], [0], [0], [1], [0, 0, 1, 1], [], []>} : vector<96x64xbf16>, vector<64x64xbf16>, vector<96x64xf32> -> vector<96x64xf32>
      %55 = arith.addf %47, %54 : vector<96x64xf32>
      %c56_i32 = arith.constant 56 : i32
      %56 = arith.addi %8, %c56_i32 : i32
      %57 = arith.index_cast %56 : i32 to index
      %c0_39 = arith.constant 0 : index
      %58 = vector.load %arg10[%57, %c0_39] : memref<3040x64xf32, #tpu.memory_space<vmem>>, vector<96x64xf32>
      %59 = arith.truncf %58 : vector<96x64xf32> to vector<96x64xbf16>
      %c6 = arith.constant 6 : index
      %c0_40 = arith.constant 0 : index
      %c0_41 = arith.constant 0 : index
      %60 = vector.load %arg6[%c6, %c0_40, %c0_41] : memref<9x64x64xbf16, #tpu.memory_space<vmem>>, vector<1x64x64xbf16>
      %61 = vector.shape_cast %60 : vector<1x64x64xbf16> to vector<64x64xbf16>
      %cst_42 = arith.constant dense<0.000000e+00> : vector<96x64xf32>
      %62 = tpu.matmul %59, %61, %cst_42 {dimension_numbers = #tpu.dot_dimension_numbers<[1], [0], [0], [1], [0, 0, 1, 1], [], []>} : vector<96x64xbf16>, vector<64x64xbf16>, vector<96x64xf32> -> vector<96x64xf32>
      %63 = arith.addf %55, %62 : vector<96x64xf32>
      %c57_i32 = arith.constant 57 : i32
      %64 = arith.addi %8, %c57_i32 : i32
      %65 = arith.index_cast %64 : i32 to index
      %c0_43 = arith.constant 0 : index
      %66 = vector.load %arg10[%65, %c0_43] : memref<3040x64xf32, #tpu.memory_space<vmem>>, vector<96x64xf32>
      %67 = arith.truncf %66 : vector<96x64xf32> to vector<96x64xbf16>
      %c7 = arith.constant 7 : index
      %c0_44 = arith.constant 0 : index
      %c0_45 = arith.constant 0 : index
      %68 = vector.load %arg6[%c7, %c0_44, %c0_45] : memref<9x64x64xbf16, #tpu.memory_space<vmem>>, vector<1x64x64xbf16>
      %69 = vector.shape_cast %68 : vector<1x64x64xbf16> to vector<64x64xbf16>
      %cst_46 = arith.constant dense<0.000000e+00> : vector<96x64xf32>
      %70 = tpu.matmul %67, %69, %cst_46 {dimension_numbers = #tpu.dot_dimension_numbers<[1], [0], [0], [1], [0, 0, 1, 1], [], []>} : vector<96x64xbf16>, vector<64x64xbf16>, vector<96x64xf32> -> vector<96x64xf32>
      %71 = arith.addf %63, %70 : vector<96x64xf32>
      %c58_i32 = arith.constant 58 : i32
      %72 = arith.addi %8, %c58_i32 : i32
      %73 = arith.index_cast %72 : i32 to index
      %c0_47 = arith.constant 0 : index
      %74 = vector.load %arg10[%73, %c0_47] : memref<3040x64xf32, #tpu.memory_space<vmem>>, vector<96x64xf32>
      %75 = arith.truncf %74 : vector<96x64xf32> to vector<96x64xbf16>
      %c8 = arith.constant 8 : index
      %c0_48 = arith.constant 0 : index
      %c0_49 = arith.constant 0 : index
      %76 = vector.load %arg6[%c8, %c0_48, %c0_49] : memref<9x64x64xbf16, #tpu.memory_space<vmem>>, vector<1x64x64xbf16>
      %77 = vector.shape_cast %76 : vector<1x64x64xbf16> to vector<64x64xbf16>
      %cst_50 = arith.constant dense<0.000000e+00> : vector<96x64xf32>
      %78 = tpu.matmul %75, %77, %cst_50 {dimension_numbers = #tpu.dot_dimension_numbers<[1], [0], [0], [1], [0, 0, 1, 1], [], []>} : vector<96x64xbf16>, vector<64x64xbf16>, vector<96x64xf32> -> vector<96x64xf32>
      %79 = arith.addf %71, %78 : vector<96x64xf32>
      %c0_51 = arith.constant 0 : index
      %c0_52 = arith.constant 0 : index
      %80 = vector.load %arg7[%c0_51, %c0_52] : memref<1x64xf32, #tpu.memory_space<vmem>>, vector<1x64xf32>
      %81 = vector.broadcast %80 : vector<1x64xf32> to vector<96x64xf32>
      %82 = arith.addf %79, %81 : vector<96x64xf32>
      %cst_53 = arith.constant 0.000000e+00 : f32
      %83 = vector.broadcast %cst_53 : f32 to vector<96x64xf32>
      %84 = arith.maximumf %82, %83 : vector<96x64xf32>
      %85 = arith.index_cast %8 : i32 to index
      %c0_54 = arith.constant 0 : index
      %86 = vector.load %arg8[%85, %c0_54] : memref<2976x64xf32, #tpu.memory_space<vmem>>, vector<96x64xf32>
      tpu.vector_store %arg8[%85, %c0_54], %84 {strides = array<i32>} : memref<2976x64xf32, #tpu.memory_space<vmem>>, vector<96x64xf32>,
    }
    %c31_i32_11 = arith.constant 31 : i32
    return
  }
  func.func @transform_0(%arg0: i32) -> (i32, i32) {
    %c0_i32 = arith.constant 0 : i32
    %c0_i32_0 = arith.constant 0 : i32
    return %arg0, %c0_i32 : i32, i32
  }
  func.func @transform_1(%arg0: i32) -> (i32, i32) {
    %c0_i32 = arith.constant 0 : i32
    %c0_i32_0 = arith.constant 0 : i32
    %c0_i32_1 = arith.constant 0 : i32
    return %c0_i32, %c0_i32_0 : i32, i32
  }
  func.func @transform_2(%arg0: i32) -> (i32, i32) {
    %c0_i32 = arith.constant 0 : i32
    %c0_i32_0 = arith.constant 0 : i32
    %c0_i32_1 = arith.constant 0 : i32
    return %c0_i32, %c0_i32_0 : i32, i32
  }
  func.func @transform_3(%arg0: i32) -> (i32, i32, i32) {
    %c0_i32 = arith.constant 0 : i32
    %c0_i32_0 = arith.constant 0 : i32
    %c0_i32_1 = arith.constant 0 : i32
    %c0_i32_2 = arith.constant 0 : i32
    return %c0_i32, %c0_i32_0, %c0_i32_1 : i32, i32, i32
  }
  func.func @transform_4(%arg0: i32) -> (i32, i32) {
    %c0_i32 = arith.constant 0 : i32
    %c0_i32_0 = arith.constant 0 : i32
    %c0_i32_1 = arith.constant 0 : i32
    return %c0_i32, %c0_i32_0 : i32, i32
  }
  func.func @transform_5(%arg0: i32) -> (i32, i32, i32) {
    %c0_i32 = arith.constant 0 : i32
    %c0_i32_0 = arith.constant 0 : i32
    %c0_i32_1 = arith.constant 0 : i32
    %c0_i32_2 = arith.constant 0 : i32
    return %c0_i32, %c0_i32_0, %c0_i32_1 : i32, i32, i32
  }
  func.func @transform_6(%arg0: i32) -> (i32, i32) {
    %c0_i32 = arith.constant 0 : i32
    %c0_i32_0 = arith.constant 0 : i32
    %c0_i32_1 = arith.constant 0 : i32
    return %c0_i32, %c0_i32_0 : i32, i32
  }
  func.func @transform_7(%arg0: i32) -> (i32, i32) {
    %c0_i32 = arith.constant 0 : i32
    %c0_i32_0 = arith.constant 0 : i32
    return %arg0, %c0_i32 : i32, i32
  }
}

</mosaic_0001>

<bundles_post_ra>
// kernel: image_classifier_forward.1
= control target key start
LH: loop header
LB: loop body
LE: loop exit
PB: predicated region body
PF: predicated region fallthrough
CT: control target
= control target key end

     0   :  { %vm27_vm0 = vcmask 261120   ;;  %v3091_v0 = vmov 0.0   ;;  %vm36_vm1 = vcmask 523264   ;;  %s3148_s24 = smov 0   ;;  %s3957_s0 = inlined_call_operand.vmem [shape: f32[2976,16], index: 0, kind: input, shape index: {}]   ;;  %s3958_s1 = inlined_call_operand.vmem [shape: bf16[16,32], index: 1, kind: input, shape index: {}]   ;;  %s3959_s2 = inlined_call_operand.vmem [shape: f32[1,32], index: 2, kind: input, shape index: {}]   ;;  %s3960_s3 = inlined_call_operand.vmem [shape: bf16[9,32,64], index: 3, kind: input, shape index: {}]   ;;  %s3961_s4 = inlined_call_operand.vmem [shape: f32[1,64], index: 4, kind: input, shape index: {}]   ;;  %s3962_s5 = inlined_call_operand.vmem [shape: bf16[9,64,64], index: 5, kind: input, shape index: {}]   ;;  %s3963_s6 = inlined_call_operand.vmem [shape: f32[1,64], index: 6, kind: input, shape index: {}]   ;;  %s3964_s7 = inlined_call_operand.vmem [shape: f32[2976,64], index: 7, kind: output, shape index: {}]  }
   0x1   :  { %28 = vst.msk [vmem:[#allocation2 + $0xba0] sm:$0xff] %vm27_vm0, %v3091_v0 }
   0x2   :  { %29 = vst.msk [vmem:[#allocation2 + $0xba8] sm:$0xff] %vm27_vm0, %v3091_v0 }
   0x3   :  { %30 = vst.msk [vmem:[#allocation2 + $0xbb0] sm:$0xff] %vm27_vm0, %v3091_v0 }
   0x4   :  { %31 = vst.msk [vmem:[#allocation2 + $0xbb8] sm:$0xff] %vm27_vm0, %v3091_v0 }
   0x5   :  { %32 = vst.msk [vmem:[#allocation2 + $0xbc0] sm:$0xff] %vm27_vm0, %v3091_v0 }
   0x6   :  { %33 = vst.msk [vmem:[#allocation2 + $0xbc8] sm:$0xff] %vm27_vm0, %v3091_v0 }
   0x7   :  { %34 = vst.msk [vmem:[#allocation2 + $0xbd0] sm:$0xff] %vm27_vm0, %v3091_v0 }
   0x8   :  { %35 = vst.msk [vmem:[#allocation2 + $0xbd8] sm:$0xff] %vm27_vm0, %v3091_v0 }
   0x9   :  { %37 = vst.msk [vmem:[#allocation3 + $0xba0] sm:$0xff] %vm36_vm1, %v3091_v0 }
   0xa   :  { %38 = vst.msk [vmem:[#allocation3 + $0xba8] sm:$0xff] %vm36_vm1, %v3091_v0 }
   0xb   :  { %39 = vst.msk [vmem:[#allocation3 + $0xbb0] sm:$0xff] %vm36_vm1, %v3091_v0 }
   0xc   :  { %40 = vst.msk [vmem:[#allocation3 + $0xbb8] sm:$0xff] %vm36_vm1, %v3091_v0 }
   0xd   :  { %41 = vst.msk [vmem:[#allocation3 + $0xbc0] sm:$0xff] %vm36_vm1, %v3091_v0 }
   0xe   :  { %42 = vst.msk [vmem:[#allocation3 + $0xbc8] sm:$0xff] %vm36_vm1, %v3091_v0 }
   0xf   :  { %43 = vst.msk [vmem:[#allocation3 + $0xbd0] sm:$0xff] %vm36_vm1, %v3091_v0 }
  0x10   :  { %44 = vst.msk [vmem:[#allocation3 + $0xbd8] sm:$0xff] %vm36_vm1, %v3091_v0 }
  0x11 LB: > { %v2963_v1 = vld [vmem:[%s3958_s1] sm:$0xff]  ;;  %s51_s27 = smul.u32 96, %s3081_s24  ;;  %vm83_vm2 = vcmask 130048   ;;  %s50_s24 = sadd.s32 1, %s3081_s24   ;;  %s3081_s24 = sphi %s3148_s24, %s50_s24  }
  0x12   : > { %3018 = vmatpush.bf16.msra.mxu1 %v2963_v1  ;;  %3019 = vmatpush.bf16.msra.mxu2 %v2963_v1  ;;  %v3064_v20 = vld [vmem:[%s3959_s2] ss:$0 sm:$0xff]  ;;  %p47_p0 = scmp.ge.s32.totalorder %s50_s24, 31  }
  0x13   : > { %3020 = vmatpush.bf16.msra.mxu3 %v2963_v1  ;;  %109 = vmatpush.bf16.msra.mxu0 %v2963_v1  ;;  %s52_s30 = scalar_lea.vmem %s3957_s0, %s51_s27  ;;  %s3173_s10 = scalar_lea.vmem [#allocation2], %s51_s27 }
  0x14   : > { %v55_v2 = vld [vmem:[%s52_s30 + $0x10] sm:$0xff]  ;;  %v56_v3 = vld [vmem:[%s52_s30 + $0x18] sm:$0xff]  ;;  %v53_v11 = vld [vmem:[%s52_s30] sm:$0xff]  ;;  %s3202_s11 = smov (%p47_p0), 0  }
  0x15   : > { %v59_v4 = vld [vmem:[%s52_s30 + $0x30] sm:$0xff]  ;;  %v66_v5 = vpack.c.bf16 %v56_v3, %v55_v2  ;;  %v60_v6 = vld [vmem:[%s52_s30 + $0x38] sm:$0xff]  ;;  %v54_v12 = vld [vmem:[%s52_s30 + $0x8] sm:$0xff] }
  0x16   : > { %v63_v7 = vld [vmem:[%s52_s30 + $0x50] sm:$0xff]  ;;  %v64_v8 = vld [vmem:[%s52_s30 + $0x58] sm:$0xff]  ;;  %v68_v9 = vpack.c.bf16 %v60_v6, %v59_v4  ;;  %v65_v13 = vpack.c.bf16 %v54_v12, %v53_v11  ;;  %v57_v14 = vld [vmem:[%s52_s30 + $0x20] sm:$0xff] }
  0x17   : > { %v70_v10 = vpack.c.bf16 %v64_v8, %v63_v7  ;;  %2346 = vmatmul.msk.bf16.vlgmr.msra.gmra.mxu1 %vm83_vm2, %v66_v5  ;;  %v58_v15 = vld [vmem:[%s52_s30 + $0x28] sm:$0xff]  ;;  %v61_v16 = vld [vmem:[%s52_s30 + $0x40] sm:$0xff] }
  0x18   : > { %2348 = vmatmul.msk.bf16.vlgmr.msra.gmra.mxu2 %vm83_vm2, %v68_v9  ;;  %2345 = vmatmul.msk.bf16.vlgmr.msra.gmra.mxu0 %vm83_vm2, %v65_v13  ;;  %v62_v17 = vld [vmem:[%s52_s30 + $0x48] sm:$0xff]  ;;  %v67_v18 = vpack.c.bf16 %v58_v15, %v57_v14 }
  0x19   : > { %2350 = vmatmul.msk.bf16.vlgmr.msra.gmra.mxu3 %vm83_vm2, %v70_v10  ;;  %v69_v19 = vpack.c.bf16 %v62_v17, %v61_v16 }
  0x27   : > { %2347 = vmatmul.msk.bf16.gmra.mxu1 %vm83_vm2, %v67_v18 }
  0x28   : > { %2349 = vmatmul.msk.bf16.gmra.mxu2 %vm83_vm2, %v69_v19 }
  0x94   : > { %v116_v21 = vpop.f32.mrf.mxu1 }
  0x95   : > { %v117_v22 = vadd.f32 %v3064_v20, %v116_v21  ;;  %v111_v23 = vpop.f32.mrf.mxu0 }
  0x96   : > { %v112_v25 = vadd.f32 %v3064_v20, %v111_v23 }
  0x97   : > { %v143_v24 = vmax.f32 %v117_v22, 0.0 }
  0x98   : > { %v141_v26 = vmax.f32 %v112_v25, 0.0 }
  0x99   : > { %156 = vst.msk [vmem:[%s3173_s10 + $0x10] sm:$0xff] %vm27_vm0, %v143_v24 }
  0x9a   : > { %154 = vst.msk [vmem:[%s3173_s10] sm:$0xff] %vm27_vm0, %v141_v26 }
  0x9b   : > { %v126_v27 = vpop.f32.mrf.mxu2 }
  0x9c   : > { %v136_v28 = vpop.f32.mrf.mxu3  ;;  %v127_v29 = vadd.f32 %v3064_v20, %v126_v27  ;;  %v118_v30 = vpop.f32.mrf.mxu1 }
  0x9d   : > { %v137_v31 = vadd.f32 %v3064_v20, %v136_v28  ;;  %v119_v32 = vadd.f32 %v3064_v20, %v118_v30  ;;  %v113_v35 = vpop.f32.mrf.mxu0 }
  0x9e   : > { %v147_v33 = vmax.f32 %v127_v29, 0.0  ;;  %v114_v37 = vadd.f32 %v3064_v20, %v113_v35 }
  0x9f   : > { %v151_v34 = vmax.f32 %v137_v31, 0.0  ;;  %v144_v36 = vmax.f32 %v119_v32, 0.0 }
  0xa0   : > { %160 = vst.msk [vmem:[%s3173_s10 + $0x30] sm:$0xff] %vm27_vm0, %v147_v33  ;;  %v142_v38 = vmax.f32 %v114_v37, 0.0 }
  0xa1   : > { %157 = vst.msk [vmem:[%s3173_s10 + $0x18] sm:$0xff] %vm27_vm0, %v144_v36 }
  0xa2   : > { %164 = vst.msk [vmem:[%s3173_s10 + $0x50] sm:$0xff] %vm27_vm0, %v151_v34 }
  0xa3   : > { %v128_v39 = vpop.f32.mrf.mxu2  ;;  %155 = vst.msk [vmem:[%s3173_s10 + $0x8] sm:$0xff] %vm27_vm0, %v142_v38 }
  0xa4   : > { %v138_v40 = vpop.f32.mrf.mxu3  ;;  %v129_v41 = vadd.f32 %v3064_v20, %v128_v39  ;;  %v121_v42 = vpop.f32.mrf.mxu1 }
  0xa5   : > { %v139_v43 = vadd.f32 %v3064_v20, %v138_v40  ;;  %v122_v44 = vadd.f32 %v3064_v20, %v121_v42 }
  0xa6   : > { %v148_v45 = vmax.f32 %v129_v41, 0.0 }
  0xa7   : > { %v152_v46 = vmax.f32 %v139_v43, 0.0  ;;  %v145_v47 = vmax.f32 %v122_v44, 0.0 }
  0xa8   : > { %161 = vst.msk [vmem:[%s3173_s10 + $0x38] sm:$0xff] %vm27_vm0, %v148_v45 }
  0xa9   : > { %158 = vst.msk [vmem:[%s3173_s10 + $0x20] sm:$0xff] %vm27_vm0, %v145_v47 }
  0xaa   : > { %165 = vst.msk [vmem:[%s3173_s10 + $0x58] sm:$0xff] %vm27_vm0, %v152_v46 }
  0xab   : > { %v131_v48 = vpop.f32.mrf.mxu2 }
  0xac   : > { %v132_v49 = vadd.f32 %v3064_v20, %v131_v48  ;;  %v123_v50 = vpop.f32.mrf.mxu1 }
  0xad   : > { %v124_v51 = vadd.f32 %v3064_v20, %v123_v50 }
  0xae   : > { %v149_v52 = vmax.f32 %v132_v49, 0.0 }
  0xaf   : > { %v146_v53 = vmax.f32 %v124_v51, 0.0 }
  0xb0   : > { %162 = vst.msk [vmem:[%s3173_s10 + $0x40] sm:$0xff] %vm27_vm0, %v149_v52 }
  0xb1   : > { %159 = vst.msk [vmem:[%s3173_s10 + $0x28] sm:$0xff] %vm27_vm0, %v146_v53 }
  0xb3   : > { %v133_v54 = vpop.f32.mrf.mxu2 }
  0xb4   : > { %v134_v55 = vadd.f32 %v3064_v20, %v133_v54  ;;  %49 = sbr.rel (!%p47_p0) target bundleno = 17 (0x11), region = 107 }
  0xb6   : > { %v150_v56 = vmax.f32 %v134_v55, 0.0 }
  0xb8   : > { %163 = vst.msk [vmem:[%s3173_s10 + $0x48] sm:$0xff] %vm27_vm0, %v150_v56 }
  0xb9 LB: > { %v2967_v57 = vld [vmem:[%s3960_s3 + $0x18] sm:$0xff]  ;;  %v2966_v58 = vld [vmem:[%s3960_s3 + $0x10] sm:$0xff]  ;;  %s172_s16 = smul.u32 96, %s3085_s11  ;;  %v2969_v59 = vld [vmem:[%s3960_s3 + $0x28] sm:$0xff]  ;;  %s171_s11 = sadd.s32 1, %s3085_s11   ;;  %s3085_s11 = sphi %s3202_s11, %s171_s11  }
  0xba   : > { %3021 = vmatpush.bf16.msra.mxu1 %v2967_v57  ;;  %3022 = vmatpush.bf16.msra.mxu2 %v2967_v57  ;;  %v2965_v60 = vld [vmem:[%s3960_s3 + $0x8] sm:$0xff]  ;;  %v2971_v61 = vld [vmem:[%s3960_s3 + $0x38] sm:$0xff]  ;;  %v2968_v8 = vld [vmem:[%s3960_s3 + $0x20] sm:$0xff]  ;;  %p168_p1 = scmp.ge.s32.totalorder %s171_s11, 31  }
  0xbb   : > { %3023 = vmatpush.bf16.msra.mxu3 %v2967_v57  ;;  %257 = vmatpush.bf16.msra.mxu0 %v2967_v57  ;;  %v2973_v62 = vld [vmem:[%s3960_s3 + $0x48] sm:$0xff]  ;;  %s3228_s22 = scalar_lea.vmem [#allocation2], %s172_s16  ;;  %v2964_v11 = vld [vmem:[%s3960_s3] sm:$0xff]  ;;  %v2970_v13 = vld [vmem:[%s3960_s3 + $0x30] sm:$0xff]  ;;  %s3501_s25 = scalar_lea.vmem [#allocation3], %s172_s16 }
  0xbc   : > { %v2972_v14 = vld [vmem:[%s3960_s3 + $0x40] sm:$0xff]  ;;  %v2977_v15 = vld [vmem:[%s3960_s3 + $0x68] sm:$0xff]  ;;  %v2979_v16 = vld [vmem:[%s3960_s3 + $0x78] sm:$0xff]  ;;  %s3551_s16 = smov (%p168_p1), 0  }
  0xbd   : > { %v2975_v17 = vld [vmem:[%s3960_s3 + $0x58] sm:$0xff]  ;;  %v2981_v18 = vld [vmem:[%s3960_s3 + $0x88] sm:$0xff]  ;;  %v2976_v55 = vld [vmem:[%s3960_s3 + $0x60] sm:$0xff] }
  0xbe   : > { %3024 = vmatpush.bf16.msra.mxu1 %v2966_v58  ;;  %3025 = vmatpush.bf16.msra.mxu2 %v2966_v58  ;;  %v2978_v56 = vld [vmem:[%s3960_s3 + $0x70] sm:$0xff] }
  0xbf   : > { %v2353_v63 = vld [vmem:[%s3228_s22 + $0x11] sm:$0xff]  ;;  %v2354_v0 = vld [vmem:[%s3228_s22 + $0x19] sm:$0xff]  ;;  %3026 = vmatpush.bf16.msra.mxu3 %v2966_v58  ;;  %258 = vmatpush.bf16.msra.mxu0 %v2966_v58  ;;  %v2351_v9 = vld [vmem:[%s3228_s22 + $0x1] sm:$0xff] }
  0xc0   : > { %v2357_v1 = vld [vmem:[%s3228_s22 + $0x31] sm:$0xff]  ;;  %v211_v2 = vpack.c.bf16 %v2354_v0, %v2353_v63  ;;  %v3234_v3 = vld [vmem:[%s3228_s22 + $0x39] sm:$0xff]  ;;  %v2352_v10 = vld [vmem:[%s3228_s22 + $0x9] sm:$0xff] }
  0xc1   : > { %v3237_v4 = vld [vmem:[%s3228_s22 + $0x51] sm:$0xff]  ;;  %v3240_v5 = vld [vmem:[%s3228_s22 + $0x59] sm:$0xff]  ;;  %v213_v6 = vpack.c.bf16 %v3234_v3, %v2357_v1  ;;  %v210_v12 = vpack.c.bf16 %v2352_v10, %v2351_v9  ;;  %v2355_v19 = vld [vmem:[%s3228_s22 + $0x21] sm:$0xff] }
  0xc2   : > { %420 = vmatpush.bf16.msrb.mxu2 %v2969_v59  ;;  %326 = vmatpush.bf16.msrb.mxu1 %v2965_v60  ;;  %v215_v7 = vpack.c.bf16 %v3240_v5, %v3237_v4  ;;  %v2356_v20 = vld [vmem:[%s3228_s22 + $0x29] sm:$0xff]  ;;  %v3278_v21 = vld [vmem:[%s3228_s22 + $0x41] sm:$0xff]  ;;  %v2428_v36 = vld [vmem:[%s3228_s22 + $0x34] sm:$0xff] }
  0xc3   : > { %2376 = vmatmul.msk.bf16.vlgmr.msra.gmra.mxu1 %vm27_vm0, %v211_v2  ;;  %2378 = vmatmul.msk.bf16.vlgmr.msra.gmra.mxu2 %vm27_vm0, %v213_v6  ;;  %v3281_v22 = vld [vmem:[%s3228_s22 + $0x49] sm:$0xff]  ;;  %v2425_v23 = vld [vmem:[%s3228_s22 + $0x1c] sm:$0xff]  ;;  %v212_v25 = vpack.c.bf16 %v2356_v20, %v2355_v19  ;;  %v2397_v45 = vld [vmem:[%s3228_s22 + $0x12] sm:$0xff] }
  0xc4   : > { %526 = vmatpush.bf16.msrb.mxu3 %v2971_v61  ;;  %632 = vmatpush.bf16.msrb.mxu0 %v2973_v62  ;;  %v2426_v24 = vld [vmem:[%s3228_s22 + $0x24] sm:$0xff]  ;;  %v214_v26 = vpack.c.bf16 %v3281_v22, %v3278_v21  ;;  %v2427_v35 = vld [vmem:[%s3228_s22 + $0x2c] sm:$0xff]  ;;  %v2458_v40 = vld [vmem:[%s3228_s22 + $0x35] sm:$0xff] }
  0xc5   : > { %2380 = vmatmul.msk.bf16.vlgmr.msra.gmra.mxu3 %vm27_vm0, %v215_v7  ;;  %2375 = vmatmul.msk.bf16.vlgmr.msra.gmra.mxu0 %vm27_vm0, %v210_v12  ;;  %v2455_v27 = vld [vmem:[%s3228_s22 + $0x1d] sm:$0xff]  ;;  %v2456_v28 = vld [vmem:[%s3228_s22 + $0x25] sm:$0xff]  ;;  %v479_v29 = vpack.c.bf16 %v2426_v24, %v2425_v23  ;;  %v2457_v39 = vld [vmem:[%s3228_s22 + $0x2d] sm:$0xff]  ;;  %v480_v41 = vpack.c.bf16 %v2428_v36, %v2427_v35 }
  0xc6   : > { %421 = vmatpush.bf16.msrb.mxu2 %v2968_v8  ;;  %327 = vmatpush.bf16.msrb.mxu1 %v2964_v11  ;;  %v585_v30 = vpack.c.bf16 %v2456_v28, %v2455_v27  ;;  %v174_v31 = vld [vmem:[%s3228_s22] sm:$0xff]  ;;  %v175_v32 = vld [vmem:[%s3228_s22 + $0x8] sm:$0xff]  ;;  %v586_v42 = vpack.c.bf16 %v2458_v40, %v2457_v39  ;;  %v176_v43 = vld [vmem:[%s3228_s22 + $0x10] sm:$0xff] }
  0xc7   : > { %v2395_v33 = vld [vmem:[%s3228_s22 + $0x2] sm:$0xff]  ;;  %v2396_v34 = vld [vmem:[%s3228_s22 + $0xa] sm:$0xff]  ;;  %v186_v37 = vpack.c.bf16 %v175_v32, %v174_v31  ;;  %v177_v44 = vld [vmem:[%s3228_s22 + $0x18] sm:$0xff] }
  0xc8   : > { %527 = vmatpush.bf16.msrb.mxu3 %v2970_v13  ;;  %633 = vmatpush.bf16.msrb.mxu0 %v2972_v14  ;;  %v373_v38 = vpack.c.bf16 %v2396_v34, %v2395_v33  ;;  %v2398_v46 = vld [vmem:[%s3228_s22 + $0x1a] sm:$0xff]  ;;  %v2430_v48 = vld [vmem:[%s3228_s22 + $0x44] sm:$0xff]  ;;  %v187_v49 = vpack.c.bf16 %v177_v44, %v176_v43  ;;  %v2974_v57 = vld [vmem:[%s3960_s3 + $0x50] sm:$0xff] }
  0xc9   : > { %v2429_v47 = vld [vmem:[%s3228_s22 + $0x3c] sm:$0xff]  ;;  %v374_v50 = vpack.c.bf16 %v2398_v46, %v2397_v45  ;;  %v2460_v52 = vld [vmem:[%s3228_s22 + $0x45] sm:$0xff]  ;;  %v2432_v0 = vld [vmem:[%s3228_s22 + $0x54] sm:$0xff] }
  0xca   : > { %844 = vmatpush.bf16.msra.mxu2 %v2977_v15  ;;  %738 = vmatpush.bf16.msra.mxu1 %v2975_v17  ;;  %v2459_v51 = vld [vmem:[%s3228_s22 + $0x3d] sm:$0xff]  ;;  %v481_v53 = vpack.c.bf16 %v2430_v48, %v2429_v47  ;;  %v179_v60 = vld [vmem:[%s3228_s22 + $0x28] sm:$0xff]  ;;  %v2462_v7 = vld [vmem:[%s3228_s22 + $0x55] sm:$0xff] }
  0xcb   : > { %v587_v54 = vpack.c.bf16 %v2460_v52, %v2459_v51  ;;  %v2980_v58 = vld [vmem:[%s3960_s3 + $0x80] sm:$0xff]  ;;  %v2400_v62 = vld [vmem:[%s3228_s22 + $0x2a] sm:$0xff]  ;;  %v181_v11 = vld [vmem:[%s3228_s22 + $0x38] sm:$0xff] }
  0xcc   : > { %950 = vmatpush.bf16.msra.mxu3 %v2979_v16  ;;  %1056 = vmatpush.bf16.msra.mxu0 %v2981_v18  ;;  %v178_v59 = vld [vmem:[%s3228_s22 + $0x20] sm:$0xff]  ;;  %v2431_v63 = vld [vmem:[%s3228_s22 + $0x4c] sm:$0xff]  ;;  %v2466_v33 = vld [vmem:[%s3228_s22 + $0x75] sm:$0xff] }
  0xcd   : > { %v2399_v61 = vld [vmem:[%s3228_s22 + $0x22] sm:$0xff]  ;;  %v188_v1 = vpack.c.bf16 %v179_v60, %v178_v59  ;;  %v2461_v6 = vld [vmem:[%s3228_s22 + $0x4d] sm:$0xff]  ;;  %v482_v8 = vpack.c.bf16 %v2432_v0, %v2431_v63  ;;  %v2402_v13 = vld [vmem:[%s3228_s22 + $0x3a] sm:$0xff] }
  0xce   : > { %845 = vmatpush.bf16.msra.mxu2 %v2976_v55  ;;  %739 = vmatpush.bf16.msra.mxu1 %v2974_v57  ;;  %v375_v2 = vpack.c.bf16 %v2400_v62, %v2399_v61  ;;  %v588_v9 = vpack.c.bf16 %v2462_v7, %v2461_v6  ;;  %v180_v10 = vld [vmem:[%s3228_s22 + $0x30] sm:$0xff]  ;;  %v2433_v14 = vld [vmem:[%s3228_s22 + $0x5c] sm:$0xff]  ;;  %v2434_v15 = vld [vmem:[%s3228_s22 + $0x64] sm:$0xff] }
  0xcf   : > { %v2401_v12 = vld [vmem:[%s3228_s22 + $0x32] sm:$0xff]  ;;  %v189_v16 = vpack.c.bf16 %v181_v11, %v180_v10  ;;  %v2463_v18 = vld [vmem:[%s3228_s22 + $0x5d] sm:$0xff]  ;;  %v2464_v19 = vld [vmem:[%s3228_s22 + $0x65] sm:$0xff]  ;;  %v483_v20 = vpack.c.bf16 %v2434_v15, %v2433_v14 }
  0xd0   : > { %951 = vmatpush.bf16.msra.mxu3 %v2978_v56  ;;  %1057 = vmatpush.bf16.msra.mxu0 %v2980_v58  ;;  %v376_v17 = vpack.c.bf16 %v2402_v13, %v2401_v12  ;;  %v589_v23 = vpack.c.bf16 %v2464_v19, %v2463_v18  ;;  %v182_v24 = vld [vmem:[%s3228_s22 + $0x40] sm:$0xff]  ;;  %v2404_v27 = vld [vmem:[%s3228_s22 + $0x4a] sm:$0xff]  ;;  %v2582_v15 = vld [vmem:[%s3228_s22 + $0x72] sm:$0xff] }
  0xd1   : > { %v2435_v28 = vld [vmem:[%s3228_s22 + $0x6c] sm:$0xff]  ;;  %v2406_v39 = vld [vmem:[%s3228_s22 + $0x5a] sm:$0xff]  ;;  %v797_v47 = vpack.c.bf16 %v182_v24, %v181_v11  ;;  %v2580_v58 = vld [vmem:[%s3228_s22 + $0x62] sm:$0xff] }
  0xd2   : > { %v2465_v32 = vld [vmem:[%s3228_s22 + $0x6d] sm:$0xff]  ;;  %v2485_v44 = vld [vmem:[%s3228_s22 + $0x1e] sm:$0xff]  ;;  %v1011_v62 = vpack.c.bf16 %v2580_v58, %v2406_v39 }
  0xd3   : > { %2377 = vmatmul.msk.bf16.gmra.mxu1 %vm27_vm0, %v212_v25  ;;  %2379 = vmatmul.msk.bf16.gmra.mxu2 %vm27_vm0, %v214_v26  ;;  %v183_v25 = vld [vmem:[%s3228_s22 + $0x48] sm:$0xff]  ;;  %v590_v35 = vpack.c.bf16 %v2466_v33, %v2465_v32  ;;  %v184_v36 = vld [vmem:[%s3228_s22 + $0x50] sm:$0xff]  ;;  %v2493_v58 = vld [vmem:[%s3228_s22 + $0x5e] sm:$0xff] }
  0xd4   : > { %v2403_v26 = vld [vmem:[%s3228_s22 + $0x42] sm:$0xff]  ;;  %v798_v57 = vpack.c.bf16 %v184_v36, %v183_v25  ;;  %v2552_v11 = vld [vmem:[%s3228_s22 + $0x71] sm:$0xff] }
  0xd5   : > { %2449 = vmatmul.msk.bf16.vlgmr.msrb.gmra.mxu3 %vm27_vm0, %v479_v29  ;;  %2479 = vmatmul.msk.bf16.vlgmr.msrb.gmra.mxu0 %vm27_vm0, %v585_v30  ;;  %v2436_v29 = vld [vmem:[%s3228_s22 + $0x74] sm:$0xff]  ;;  %v190_v30 = vpack.c.bf16 %v183_v25, %v182_v24  ;;  %v377_v31 = vpack.c.bf16 %v2404_v27, %v2403_v26  ;;  %v1009_v43 = vpack.c.bf16 %v2403_v26, %v2402_v13  ;;  %v2486_v45 = vld [vmem:[%s3228_s22 + $0x26] sm:$0xff] }
  0xd6   : > { %v484_v34 = vpack.c.bf16 %v2436_v29, %v2435_v28  ;;  %v691_v46 = vpack.c.bf16 %v2486_v45, %v2485_v44  ;;  %v2550_v55 = vld [vmem:[%s3228_s22 + $0x61] sm:$0xff]  ;;  %v2551_v10 = vld [vmem:[%s3228_s22 + $0x69] sm:$0xff]  ;;  %v2492_v33 = vld [vmem:[%s3228_s22 + $0x56] sm:$0xff] }
  0xd7   : > { %v905_v61 = vpack.c.bf16 %v2550_v55, %v3240_v5  ;;  %v2489_v5 = vld [vmem:[%s3228_s22 + $0x3e] sm:$0xff]  ;;  %v2490_v7 = vld [vmem:[%s3228_s22 + $0x46] sm:$0xff]  ;;  %v906_v19 = vpack.c.bf16 %v2552_v11, %v2551_v10 }
  0xd8   : > { %v693_v12 = vpack.c.bf16 %v2490_v7, %v2489_v5  ;;  %v2581_v14 = vld [vmem:[%s3228_s22 + $0x6a] sm:$0xff] }
  0xd9   : > { %v2555_v7 = vld [vmem:[%s3228_s22 + $0x89] sm:$0xff] }
  0xe3   : > { %2389 = vmatmul.msk.bf16.vlgmr.msrb.gmra.mxu1 %vm27_vm0, %v186_v37  ;;  %2419 = vmatmul.msk.bf16.vlgmr.msrb.gmra.mxu2 %vm27_vm0, %v373_v38  ;;  %v3367_v37 = vld [vmem:[%s3228_s22 + $0x58] sm:$0xff] }
  0xe4   : > { %v2405_v38 = vld [vmem:[%s3228_s22 + $0x52] sm:$0xff]  ;;  %v191_v40 = vpack.c.bf16 %v3367_v37, %v184_v36 }
  0xe5   : > { %2450 = vmatmul.msk.bf16.gmra.mxu3 %vm27_vm0, %v480_v41  ;;  %2480 = vmatmul.msk.bf16.gmra.mxu0 %vm27_vm0, %v586_v42  ;;  %v378_v41 = vpack.c.bf16 %v2406_v39, %v2405_v38  ;;  %v903_v42 = vpack.c.bf16 %v3278_v21, %v3234_v3  ;;  %v904_v3 = vpack.c.bf16 %v3237_v4, %v3281_v22  ;;  %v2488_v4 = vld [vmem:[%s3228_s22 + $0x36] sm:$0xff] }
  0xe6   : > { %v1010_v21 = vpack.c.bf16 %v2405_v38, %v2404_v27  ;;  %v2554_v38 = vld [vmem:[%s3228_s22 + $0x81] sm:$0xff] }
  0xf3   : > { %2390 = vmatmul.msk.bf16.gmra.mxu1 %vm27_vm0, %v187_v49  ;;  %2420 = vmatmul.msk.bf16.gmra.mxu2 %vm27_vm0, %v374_v50 }
  0xf5   : > { %2451 = vmatmul.msk.bf16.gmra.mxu3 %vm27_vm0, %v481_v53  ;;  %2481 = vmatmul.msk.bf16.gmra.mxu0 %vm27_vm0, %v587_v54  ;;  %v2487_v54 = vld [vmem:[%s3228_s22 + $0x2e] sm:$0xff] }
  0xf6   : > { %v692_v56 = vpack.c.bf16 %v2488_v4, %v2487_v54 }
 0x103   : > { %2391 = vmatmul.msk.bf16.gmra.mxu1 %vm27_vm0, %v188_v1  ;;  %2421 = vmatmul.msk.bf16.gmra.mxu2 %vm27_vm0, %v375_v2 }
 0x105   : > { %2452 = vmatmul.msk.bf16.gmra.mxu3 %vm27_vm0, %v482_v8  ;;  %2482 = vmatmul.msk.bf16.gmra.mxu0 %vm27_vm0, %v588_v9  ;;  %v2520_v8 = vld [vmem:[%s3228_s22 + $0x60] sm:$0xff] }
 0x106   : > { %v799_v13 = vpack.c.bf16 %v2520_v8, %v3367_v37  ;;  %v2553_v37 = vld [vmem:[%s3228_s22 + $0x79] sm:$0xff]  ;;  %v2556_v8 = vld [vmem:[%s3228_s22 + $0x91] sm:$0xff] }
 0x113   : > { %2392 = vmatmul.msk.bf16.gmra.mxu1 %vm27_vm0, %v189_v16  ;;  %2422 = vmatmul.msk.bf16.gmra.mxu2 %vm27_vm0, %v376_v17 }
 0x115   : > { %2453 = vmatmul.msk.bf16.gmra.mxu3 %vm27_vm0, %v483_v20  ;;  %2483 = vmatmul.msk.bf16.gmra.mxu0 %vm27_vm0, %v589_v23  ;;  %v1012_v20 = vpack.c.bf16 %v2582_v15, %v2581_v14  ;;  %v2586_v14 = vld [vmem:[%s3228_s22 + $0x92] sm:$0xff] }
 0x123   : > { %2393 = vmatmul.msk.bf16.gmra.mxu1 %vm27_vm0, %v190_v30  ;;  %2423 = vmatmul.msk.bf16.gmra.mxu2 %vm27_vm0, %v377_v31  ;;  %v2491_v30 = vld [vmem:[%s3228_s22 + $0x4e] sm:$0xff] }
 0x125   : > { %2454 = vmatmul.msk.bf16.gmra.mxu3 %vm27_vm0, %v484_v34  ;;  %2484 = vmatmul.msk.bf16.gmra.mxu0 %vm27_vm0, %v590_v35  ;;  %v2521_v34 = vld [vmem:[%s3228_s22 + $0x68] sm:$0xff]  ;;  %v2522_v35 = vld [vmem:[%s3228_s22 + $0x70] sm:$0xff] }
 0x133   : > { %2394 = vmatmul.msk.bf16.gmra.mxu1 %vm27_vm0, %v191_v40  ;;  %2424 = vmatmul.msk.bf16.gmra.mxu2 %vm27_vm0, %v378_v41  ;;  %v694_v40 = vpack.c.bf16 %v2492_v33, %v2491_v30  ;;  %v800_v41 = vpack.c.bf16 %v2522_v35, %v2521_v34  ;;  %v2496_v34 = vld [vmem:[%s3228_s22 + $0x76] sm:$0xff]  ;;  %v2525_v35 = vld [vmem:[%s3228_s22 + $0x88] sm:$0xff] }
 0x135   : > { %2569 = vmatmul.msk.bf16.vlgmr.msra.gmra.mxu3 %vm27_vm0, %v903_v42  ;;  %2599 = vmatmul.msk.bf16.vlgmr.msra.gmra.mxu0 %vm27_vm0, %v1009_v43  ;;  %v2583_v42 = vld [vmem:[%s3228_s22 + $0x7a] sm:$0xff]  ;;  %v2584_v43 = vld [vmem:[%s3228_s22 + $0x82] sm:$0xff] }
 0x140   : > { %v3380_v48 = vpop.f32.mrf.mxu1 }
 0x142   : > { %v260_v49 = vpop.f32.mrf.mxu0 }
 0x143   : > { %2509 = vmatmul.msk.bf16.vlgmr.msra.gmra.mxu1 %vm27_vm0, %v691_v46  ;;  %2539 = vmatmul.msk.bf16.vlgmr.msra.gmra.mxu2 %vm27_vm0, %v797_v47 }
 0x145   : > { %2570 = vmatmul.msk.bf16.gmra.mxu3 %vm27_vm0, %v904_v3  ;;  %2600 = vmatmul.msk.bf16.gmra.mxu0 %vm27_vm0, %v1010_v21  ;;  %v907_v3 = vpack.c.bf16 %v2554_v38, %v2553_v37  ;;  %v1013_v21 = vpack.c.bf16 %v2584_v43, %v2583_v42 }
 0x146   : > { %v3387_v50 = vpop.f32.mrf.mxu2 }
 0x148   : > { %v3390_v51 = vpop.f32.mrf.mxu1  ;;  %v3392_v52 = vpop.f32.mrf.mxu3 }
 0x14a   : > { %v262_v53 = vpop.f32.mrf.mxu0 }
 0x14e   : > { %v3396_v22 = vpop.f32.mrf.mxu2 }
 0x150   : > { %v3400_v59 = vpop.f32.mrf.mxu1  ;;  %v3402_v60 = vpop.f32.mrf.mxu3 }
 0x152   : > { %v635_v63 = vpop.f32.mrf.mxu0 }
 0x153   : > { %2510 = vmatmul.msk.bf16.gmra.mxu1 %vm27_vm0, %v692_v56  ;;  %2540 = vmatmul.msk.bf16.gmra.mxu2 %vm27_vm0, %v798_v57 }
 0x155   : > { %2571 = vmatmul.msk.bf16.gmra.mxu3 %vm27_vm0, %v905_v61  ;;  %2601 = vmatmul.msk.bf16.gmra.mxu0 %vm27_vm0, %v1011_v62 }
 0x156   : > { %v3408_v0 = vpop.f32.mrf.mxu2 }
 0x158   : > { %v3411_v1 = vpop.f32.mrf.mxu1  ;;  %v529_v2 = vpop.f32.mrf.mxu3 }
 0x15a   : > { %v637_v6 = vpop.f32.mrf.mxu0 }
 0x15e   : > { %v3416_v9 = vpop.f32.mrf.mxu2 }
 0x160   : > { %v329_v16 = vpop.f32.mrf.mxu1  ;;  %v531_v17 = vpop.f32.mrf.mxu3 }
 0x161   : > { %v330_v18 = vadd.f32 %v329_v16, %v260_v49 }
 0x162   : > { %v640_v23 = vpop.f32.mrf.mxu0 }
 0x163   : > { %2511 = vmatmul.msk.bf16.gmra.mxu1 %vm27_vm0, %v693_v12  ;;  %2541 = vmatmul.msk.bf16.gmra.mxu2 %vm27_vm0, %v799_v13  ;;  %v2585_v13 = vld [vmem:[%s3228_s22 + $0x8a] sm:$0xff] }
 0x165   : > { %2572 = vmatmul.msk.bf16.gmra.mxu3 %vm27_vm0, %v906_v19  ;;  %2602 = vmatmul.msk.bf16.gmra.mxu0 %vm27_vm0, %v1012_v20  ;;  %v1014_v19 = vpack.c.bf16 %v2586_v14, %v2585_v13 }
 0x166   : > { %v423_v24 = vpop.f32.mrf.mxu2 }
 0x167   : > { %v453_v25 = vadd.f32 %v423_v24, %v330_v18  ;;  %v908_v18 = vpack.c.bf16 %v2556_v8, %v2555_v7 }
 0x168   : > { %v331_v26 = vpop.f32.mrf.mxu1  ;;  %v534_v27 = vpop.f32.mrf.mxu3 }
 0x169   : > { %v559_v28 = vadd.f32 %v529_v2, %v453_v25  ;;  %v332_v29 = vadd.f32 %v331_v26, %v262_v53  ;;  %v2523_v2 = vld [vmem:[%s3228_s22 + $0x78] sm:$0xff] }
 0x16a   : > { %v642_v31 = vpop.f32.mrf.mxu0 }
 0x16b   : > { %v3428_v32 = vadd.f32 %v635_v63, %v559_v28  ;;  %v2494_v63 = vld [vmem:[%s3228_s22 + $0x66] sm:$0xff] }
 0x16c   : > { %v695_v11 = vpack.c.bf16 %v2494_v63, %v2493_v58 }
 0x16e   : > { %v425_v36 = vpop.f32.mrf.mxu2 }
 0x16f   : > { %v454_v39 = vadd.f32 %v425_v36, %v332_v29  ;;  %v2495_v29 = vld [vmem:[%s3228_s22 + $0x6e] sm:$0xff] }
 0x170   : > { %v334_v44 = vpop.f32.mrf.mxu1  ;;  %v536_v45 = vpop.f32.mrf.mxu3  ;;  %v2526_v36 = vld [vmem:[%s3228_s22 + $0x90] sm:$0xff]  ;;  %v696_v38 = vpack.c.bf16 %v2496_v34, %v2495_v29 }
 0x171   : > { %v560_v46 = vadd.f32 %v531_v17, %v454_v39  ;;  %v335_v47 = vadd.f32 %v334_v44, %v3380_v48  ;;  %v802_v39 = vpack.c.bf16 %v2526_v36, %v2525_v35 }
 0x172   : > { %v645_v49 = vpop.f32.mrf.mxu0 }
 0x173   : > { %2512 = vmatmul.msk.bf16.gmra.mxu1 %vm27_vm0, %v694_v40  ;;  %2542 = vmatmul.msk.bf16.gmra.mxu2 %vm27_vm0, %v800_v41  ;;  %v3440_v53 = vadd.f32 %v637_v6, %v560_v46  ;;  %v2524_v6 = vld [vmem:[%s3228_s22 + $0x80] sm:$0xff] }
 0x174   : > { %v801_v12 = vpack.c.bf16 %v2524_v6, %v2523_v2 }
 0x175   : > { %2573 = vmatmul.msk.bf16.gmra.mxu3 %vm27_vm0, %v907_v3  ;;  %2603 = vmatmul.msk.bf16.gmra.mxu0 %vm27_vm0, %v1013_v21 }
 0x176   : > { %v428_v54 = vpop.f32.mrf.mxu2 }
 0x177   : > { %v455_v48 = vadd.f32 %v428_v54, %v335_v47 }
 0x178   : > { %v336_v4 = vpop.f32.mrf.mxu1  ;;  %v539_v55 = vpop.f32.mrf.mxu3 }
 0x179   : > { %v561_v56 = vadd.f32 %v534_v27, %v455_v48  ;;  %v337_v57 = vadd.f32 %v336_v4, %v3390_v51 }
 0x17a   : > { %v647_v61 = vpop.f32.mrf.mxu0 }
 0x17b   : > { %v3446_v62 = vadd.f32 %v640_v23, %v561_v56 }
 0x17e   : > { %v430_v5 = vpop.f32.mrf.mxu2 }
 0x17f   : > { %v456_v10 = vadd.f32 %v430_v5, %v337_v57 }
 0x180   : > { %v339_v15 = vpop.f32.mrf.mxu1  ;;  %v541_v16 = vpop.f32.mrf.mxu3 }
 0x181   : > { %v562_v17 = vadd.f32 %v536_v45, %v456_v10  ;;  %v340_v51 = vadd.f32 %v339_v15, %v3400_v59 }
 0x182   : > { %v650_v20 = vpop.f32.mrf.mxu0 }
 0x183   : > { %2513 = vmatmul.msk.bf16.gmra.mxu1 %vm27_vm0, %v695_v11  ;;  %2543 = vmatmul.msk.bf16.gmra.mxu2 %vm27_vm0, %v801_v12  ;;  %v3458_v23 = vadd.f32 %v642_v31, %v562_v17 }
 0x185   : > { %2574 = vmatmul.msk.bf16.gmra.mxu3 %vm27_vm0, %v908_v18  ;;  %2604 = vmatmul.msk.bf16.gmra.mxu0 %vm27_vm0, %v1014_v19 }
 0x186   : > { %v433_v24 = vpop.f32.mrf.mxu2 }
 0x187   : > { %v457_v25 = vadd.f32 %v433_v24, %v340_v51 }
 0x188   : > { %v341_v26 = vpop.f32.mrf.mxu1  ;;  %v544_v59 = vpop.f32.mrf.mxu3 }
 0x189   : > { %v563_v27 = vadd.f32 %v539_v55, %v457_v25  ;;  %v342_v28 = vadd.f32 %v341_v26, %v3411_v1 }
 0x18a   : > { %v652_v30 = vpop.f32.mrf.mxu0 }
 0x18b   : > { %v3464_v33 = vadd.f32 %v645_v49, %v563_v27 }
 0x18e   : > { %v435_v31 = vpop.f32.mrf.mxu2 }
 0x18f   : > { %v458_v37 = vadd.f32 %v435_v31, %v342_v28 }
 0x190   : > { %v344_v40 = vpop.f32.mrf.mxu1  ;;  %v546_v41 = vpop.f32.mrf.mxu3 }
 0x191   : > { %v564_v42 = vadd.f32 %v541_v16, %v458_v37  ;;  %v345_v44 = vadd.f32 %v344_v40, %v3387_v50 }
 0x192   : > { %v655_v43 = vpop.f32.mrf.mxu0 }
 0x193   : > { %2514 = vmatmul.msk.bf16.gmra.mxu1 %vm27_vm0, %v696_v38  ;;  %2544 = vmatmul.msk.bf16.gmra.mxu2 %vm27_vm0, %v802_v39  ;;  %v3471_v1 = vadd.f32 %v647_v61, %v564_v42 }
 0x196   : > { %v438_v45 = vpop.f32.mrf.mxu2 }
 0x197   : > { %v459_v46 = vadd.f32 %v438_v45, %v345_v44 }
 0x198   : > { %v346_v47 = vpop.f32.mrf.mxu1  ;;  %v549_v3 = vpop.f32.mrf.mxu3 }
 0x199   : > { %v565_v21 = vadd.f32 %v544_v59, %v459_v46  ;;  %v347_v48 = vadd.f32 %v346_v47, %v3396_v22 }
 0x19a   : > { %v657_v49 = vpop.f32.mrf.mxu0 }
 0x19b   : > { %v3474_v54 = vadd.f32 %v650_v20, %v565_v21 }
 0x19e   : > { %v440_v4 = vpop.f32.mrf.mxu2 }
 0x19f   : > { %v460_v55 = vadd.f32 %v440_v4, %v347_v48 }
 0x1a0   : > { %v349_v56 = vpop.f32.mrf.mxu1  ;;  %v551_v57 = vpop.f32.mrf.mxu3 }
 0x1a1   : > { %v566_v58 = vadd.f32 %v546_v41, %v460_v55  ;;  %v350_v50 = vadd.f32 %v349_v56, %v3408_v0 }
 0x1a2   : > { %v660_v63 = vpop.f32.mrf.mxu0 }
 0x1a3   : > { %v3477_v61 = vadd.f32 %v652_v30, %v566_v58 }
 0x1a6   : > { %v443_v2 = vpop.f32.mrf.mxu2 }
 0x1a7   : > { %v461_v6 = vadd.f32 %v443_v2, %v350_v50 }
 0x1a8   : > { %v351_v5 = vpop.f32.mrf.mxu1  ;;  %v554_v7 = vpop.f32.mrf.mxu3 }
 0x1a9   : > { %v567_v8 = vadd.f32 %v549_v3, %v461_v6  ;;  %v352_v22 = vadd.f32 %v351_v5, %v3416_v9 }
 0x1aa   : > { %v662_v10 = vpop.f32.mrf.mxu0 }
 0x1ab   : > { %v3480_v11 = vadd.f32 %v655_v43, %v567_v8 }
 0x1ae   : > { %v445_v12 = vpop.f32.mrf.mxu2 }
 0x1af   : > { %v462_v13 = vadd.f32 %v445_v12, %v352_v22 }
 0x1b0   : > { %v354_v14 = vpop.f32.mrf.mxu1  ;;  %v556_v15 = vpop.f32.mrf.mxu3 }
 0x1b1   : > { %v568_v16 = vadd.f32 %v551_v57, %v462_v13  ;;  %v355_v0 = vadd.f32 %v354_v14, %v3392_v52 }
 0x1b2   : > { %v1059_v17 = vpop.f32.mrf.mxu0 }
 0x1b3   : > { %v3483_v51 = vadd.f32 %v657_v49, %v568_v16 }
 0x1b6   : > { %v448_v18 = vpop.f32.mrf.mxu2 }
 0x1b7   : > { %v463_v19 = vadd.f32 %v448_v18, %v355_v0 }
 0x1b8   : > { %v356_v20 = vpop.f32.mrf.mxu1  ;;  %v953_v24 = vpop.f32.mrf.mxu3 }
 0x1b9   : > { %v569_v25 = vadd.f32 %v554_v7, %v463_v19  ;;  %v357_v59 = vadd.f32 %v356_v20, %v3402_v60  ;;  %v3495_v60 = vld [vmem:[%s3961_s4] ss:$0 sm:$0xff] }
 0x1ba   : > { %v1061_v9 = vpop.f32.mrf.mxu0 }
 0x1bb   : > { %v3486_v26 = vadd.f32 %v660_v63, %v569_v25 }
 0x1be   : > { %v450_v27 = vpop.f32.mrf.mxu2 }
 0x1bf   : > { %v464_v28 = vadd.f32 %v450_v27, %v357_v59 }
 0x1c0   : > { %v741_v29 = vpop.f32.mrf.mxu1  ;;  %v955_v30 = vpop.f32.mrf.mxu3 }
 0x1c1   : > { %v570_v34 = vadd.f32 %v556_v15, %v464_v28  ;;  %v771_v36 = vadd.f32 %v741_v29, %v3428_v32 }
 0x1c2   : > { %v1064_v37 = vpop.f32.mrf.mxu0 }
 0x1c3   : > { %v3489_v35 = vadd.f32 %v662_v10, %v570_v34 }
 0x1c6   : > { %v847_v52 = vpop.f32.mrf.mxu2 }
 0x1c7   : > { %v877_v31 = vadd.f32 %v847_v52, %v771_v36 }
 0x1c8   : > { %v743_v38 = vpop.f32.mrf.mxu1  ;;  %v958_v39 = vpop.f32.mrf.mxu3 }
 0x1c9   : > { %v983_v40 = vadd.f32 %v953_v24, %v877_v31  ;;  %v772_v43 = vadd.f32 %v743_v38, %v3440_v53 }
 0x1ca   : > { %v1066_v21 = vpop.f32.mrf.mxu0 }
 0x1cb   : > { %v1089_v41 = vadd.f32 %v1059_v17, %v983_v40 }
 0x1cd   : > { %v1105_v42 = vadd.f32 %v3495_v60, %v1089_v41 }
 0x1ce   : > { %v849_v44 = vpop.f32.mrf.mxu2 }
 0x1cf   : > { %v1117_v45 = vmax.f32 %v1105_v42, 0.0  ;;  %v878_v32 = vadd.f32 %v849_v44, %v772_v43 }
 0x1d0   : > { %v746_v46 = vpop.f32.mrf.mxu1  ;;  %v960_v47 = vpop.f32.mrf.mxu3 }
 0x1d1   : > { %1130 = vst.msk [vmem:[%s3501_s25] sm:$0xff] %vm36_vm1, %v1117_v45  ;;  %v984_v3 = vadd.f32 %v955_v30, %v878_v32  ;;  %v773_v4 = vadd.f32 %v746_v46, %v3446_v62 }
 0x1d2   : > { %v1069_v2 = vpop.f32.mrf.mxu0 }
 0x1d3   : > { %v1090_v49 = vadd.f32 %v1061_v9, %v984_v3 }
 0x1d5   : > { %v1106_v48 = vadd.f32 %v3495_v60, %v1090_v49 }
 0x1d6   : > { %v852_v53 = vpop.f32.mrf.mxu2 }
 0x1d7   : > { %v1118_v55 = vmax.f32 %v1106_v48, 0.0  ;;  %v879_v56 = vadd.f32 %v852_v53, %v773_v4 }
 0x1d8   : > { %v748_v57 = vpop.f32.mrf.mxu1  ;;  %v963_v63 = vpop.f32.mrf.mxu3 }
 0x1d9   : > { %1131 = vst.msk [vmem:[%s3501_s25 + $0x8] sm:$0xff] %vm36_vm1, %v1118_v55  ;;  %v985_v58 = vadd.f32 %v958_v39, %v879_v56  ;;  %v774_v5 = vadd.f32 %v748_v57, %v3458_v23 }
 0x1da   : > { %v1071_v17 = vpop.f32.mrf.mxu0 }
 0x1db   : > { %v1091_v50 = vadd.f32 %v1064_v37, %v985_v58 }
 0x1dd   : > { %v1107_v6 = vadd.f32 %v3495_v60, %v1091_v50 }
 0x1de   : > { %v854_v7 = vpop.f32.mrf.mxu2 }
 0x1df   : > { %v1119_v8 = vmax.f32 %v1107_v6, 0.0  ;;  %v880_v10 = vadd.f32 %v854_v7, %v774_v5 }
 0x1e0   : > { %v751_v62 = vpop.f32.mrf.mxu1  ;;  %v965_v13 = vpop.f32.mrf.mxu3 }
 0x1e1   : > { %1132 = vst.msk [vmem:[%s3501_s25 + $0x10] sm:$0xff] %vm36_vm1, %v1119_v8  ;;  %v986_v22 = vadd.f32 %v960_v47, %v880_v10  ;;  %v775_v15 = vadd.f32 %v751_v62, %v3464_v33 }
 0x1e2   : > { %v1074_v29 = vpop.f32.mrf.mxu0 }
 0x1e3   : > { %v1092_v12 = vadd.f32 %v1066_v21, %v986_v22 }
 0x1e5   : > { %v1108_v14 = vadd.f32 %v3495_v60, %v1092_v12 }
 0x1e6   : > { %v857_v16 = vpop.f32.mrf.mxu2 }
 0x1e7   : > { %v1120_v0 = vmax.f32 %v1108_v14, 0.0  ;;  %v881_v18 = vadd.f32 %v857_v16, %v775_v15 }
 0x1e8   : > { %v753_v23 = vpop.f32.mrf.mxu1  ;;  %v968_v9 = vpop.f32.mrf.mxu3 }
 0x1e9   : > { %1133 = vst.msk [vmem:[%s3501_s25 + $0x18] sm:$0xff] %vm36_vm1, %v1120_v0  ;;  %v987_v19 = vadd.f32 %v963_v63, %v881_v18  ;;  %v776_v25 = vadd.f32 %v753_v23, %v3471_v1 }
 0x1ea   : > { %v1076_v41 = vpop.f32.mrf.mxu0 }
 0x1eb   : > { %v1093_v20 = vadd.f32 %v1069_v2, %v987_v19 }
 0x1ed   : > { %v1109_v24 = vadd.f32 %v3495_v60, %v1093_v20 }
 0x1ee   : > { %v859_v59 = vpop.f32.mrf.mxu2 }
 0x1ef   : > { %v1121_v27 = vmax.f32 %v1109_v24, 0.0  ;;  %v882_v28 = vadd.f32 %v859_v59, %v776_v25 }
 0x1f0   : > { %v756_v33 = vpop.f32.mrf.mxu1  ;;  %v970_v39 = vpop.f32.mrf.mxu3 }
 0x1f1   : > { %1134 = vst.msk [vmem:[%s3501_s25 + $0x20] sm:$0xff] %vm36_vm1, %v1121_v27  ;;  %v988_v30 = vadd.f32 %v965_v13, %v882_v28  ;;  %v777_v52 = vadd.f32 %v756_v33, %v3474_v54 }
 0x1f2   : > { %v1079_v49 = vpop.f32.mrf.mxu0 }
 0x1f3   : > { %v1094_v34 = vadd.f32 %v1071_v17, %v988_v30 }
 0x1f5   : > { %v1110_v36 = vadd.f32 %v3495_v60, %v1094_v34 }
 0x1f6   : > { %v862_v31 = vpop.f32.mrf.mxu2 }
 0x1f7   : > { %v1122_v37 = vmax.f32 %v1110_v36, 0.0  ;;  %v883_v38 = vadd.f32 %v862_v31, %v777_v52 }
 0x1f8   : > { %v758_v1 = vpop.f32.mrf.mxu1  ;;  %v973_v3 = vpop.f32.mrf.mxu3 }
 0x1f9   : > { %1135 = vst.msk [vmem:[%s3501_s25 + $0x28] sm:$0xff] %vm36_vm1, %v1122_v37  ;;  %v989_v40 = vadd.f32 %v968_v9, %v883_v38  ;;  %v778_v44 = vadd.f32 %v758_v1, %v3477_v61 }
 0x1fa   : > { %v1081_v6 = vpop.f32.mrf.mxu0 }
 0x1fb   : > { %v1095_v42 = vadd.f32 %v1074_v29, %v989_v40 }
 0x1fd   : > { %v1111_v43 = vadd.f32 %v3495_v60, %v1095_v42 }
 0x1fe   : > { %v864_v45 = vpop.f32.mrf.mxu2 }
 0x1ff   : > { %v1123_v32 = vmax.f32 %v1111_v43, 0.0  ;;  %v884_v46 = vadd.f32 %v864_v45, %v778_v44 }
 0x200   : > { %v761_v54 = vpop.f32.mrf.mxu1  ;;  %v975_v63 = vpop.f32.mrf.mxu3 }
 0x201   : > { %1136 = vst.msk [vmem:[%s3501_s25 + $0x30] sm:$0xff] %vm36_vm1, %v1123_v32  ;;  %v990_v47 = vadd.f32 %v970_v39, %v884_v46  ;;  %v779_v4 = vadd.f32 %v761_v54, %v3480_v11 }
 0x203   : > { %v1096_v21 = vadd.f32 %v1076_v41, %v990_v47 }
 0x205   : > { %v1112_v48 = vadd.f32 %v3495_v60, %v1096_v21 }
 0x206   : > { %v867_v53 = vpop.f32.mrf.mxu2 }
 0x207   : > { %v1124_v55 = vmax.f32 %v1112_v48, 0.0  ;;  %v885_v56 = vadd.f32 %v867_v53, %v779_v4 }
 0x208   : > { %v763_v61 = vpop.f32.mrf.mxu1  ;;  %v978_v13 = vpop.f32.mrf.mxu3 }
 0x209   : > { %1137 = vst.msk [vmem:[%s3501_s25 + $0x38] sm:$0xff] %vm36_vm1, %v1124_v55  ;;  %v991_v57 = vadd.f32 %v973_v3, %v885_v56  ;;  %v780_v2 = vadd.f32 %v763_v61, %v3483_v51  ;;  %v1084_v51 = vpop.f32.mrf.mxu0 }
 0x20b   : > { %v1097_v58 = vadd.f32 %v1079_v49, %v991_v57 }
 0x20d   : > { %v1113_v50 = vadd.f32 %v3495_v60, %v1097_v58 }
 0x20e   : > { %v869_v5 = vpop.f32.mrf.mxu2 }
 0x20f   : > { %v1125_v7 = vmax.f32 %v1113_v50, 0.0  ;;  %v886_v8 = vadd.f32 %v869_v5, %v780_v2 }
 0x210   : > { %v766_v11 = vpop.f32.mrf.mxu1 }
 0x211   : > { %1138 = vst.msk [vmem:[%s3501_s25 + $0x40] sm:$0xff] %vm36_vm1, %v1125_v7  ;;  %v992_v10 = vadd.f32 %v975_v63, %v886_v8  ;;  %v781_v12 = vadd.f32 %v766_v11, %v3486_v26  ;;  %v980_v26 = vpop.f32.mrf.mxu3  ;;  %v1086_v9 = vpop.f32.mrf.mxu0 }
 0x213   : > { %v1098_v62 = vadd.f32 %v1081_v6, %v992_v10 }
 0x215   : > { %v1114_v22 = vadd.f32 %v3495_v60, %v1098_v62 }
 0x216   : > { %v872_v14 = vpop.f32.mrf.mxu2 }
 0x217   : > { %v1126_v15 = vmax.f32 %v1114_v22, 0.0  ;;  %v887_v16 = vadd.f32 %v872_v14, %v781_v12 }
 0x218   : > { %v768_v0 = vpop.f32.mrf.mxu1 }
 0x219   : > { %1139 = vst.msk [vmem:[%s3501_s25 + $0x48] sm:$0xff] %vm36_vm1, %v1126_v15  ;;  %v993_v17 = vadd.f32 %v978_v13, %v887_v16  ;;  %v782_v19 = vadd.f32 %v768_v0, %v3489_v35 }
 0x21b   : > { %v1099_v18 = vadd.f32 %v1084_v51, %v993_v17 }
 0x21d   : > { %v1115_v23 = vadd.f32 %v3495_v60, %v1099_v18 }
 0x21e   : > { %v874_v20 = vpop.f32.mrf.mxu2 }
 0x21f   : > { %v1127_v24 = vmax.f32 %v1115_v23, 0.0  ;;  %v888_v25 = vadd.f32 %v874_v20, %v782_v19 }
 0x221   : > { %1140 = vst.msk [vmem:[%s3501_s25 + $0x50] sm:$0xff] %vm36_vm1, %v1127_v24  ;;  %v994_v59 = vadd.f32 %v980_v26, %v888_v25 }
 0x223   : > { %v1100_v27 = vadd.f32 %v1086_v9, %v994_v59 }
 0x225   : > { %v1116_v28 = vadd.f32 %v3495_v60, %v1100_v27  ;;  %170 = sbr.rel (!%p168_p1) target bundleno = 185 (0xb9), region = 118 }
 0x227   : > { %v1128_v33 = vmax.f32 %v1116_v28, 0.0 }
 0x229   : > { %1141 = vst.msk [vmem:[%s3501_s25 + $0x58] sm:$0xff] %vm36_vm1, %v1128_v33 }
 0x22a LB: > { %v2989_v35 = vld [vmem:[%s3962_s5 + $0x38] sm:$0xff]  ;;  %v2988_v60 = vld [vmem:[%s3962_s5 + $0x30] sm:$0xff]  ;;  %s1148_s11 = smul.u32 96, %s3089_s16  ;;  %v2987_v29 = vld [vmem:[%s3962_s5 + $0x28] sm:$0xff]  ;;  %s1147_s16 = sadd.s32 1, %s3089_s16   ;;  %s3089_s16 = sphi %s3551_s16, %s1147_s16  }
 0x22b   : > { %3027 = vmatpush.bf16.msra.mxu1 %v2989_v35  ;;  %3028 = vmatpush.bf16.msra.mxu2 %v2989_v35  ;;  %v2986_v30 = vld [vmem:[%s3962_s5 + $0x20] sm:$0xff]  ;;  %v2993_v37 = vld [vmem:[%s3962_s5 + $0x58] sm:$0xff]  ;;  %v2992_v32 = vld [vmem:[%s3962_s5 + $0x50] sm:$0xff]  ;;  %p1144_p2 = scmp.ge.s32.totalorder %s1147_s16, 31  }
 0x22c   : > { %3029 = vmatpush.bf16.msra.mxu3 %v2989_v35  ;;  %1251 = vmatpush.bf16.msra.mxu0 %v2989_v35  ;;  %s3571_s9 = scalar_lea.vmem [#allocation3], %s1148_s11  ;;  %v2985_v38 = vld [vmem:[%s3962_s5 + $0x18] sm:$0xff]  ;;  %v2984_v54 = vld [vmem:[%s3962_s5 + $0x10] sm:$0xff]  ;;  %v2991_v49 = vld [vmem:[%s3962_s5 + $0x48] sm:$0xff]  ;;  %s3907_s26 = scalar_lea.vmem %s3964_s7, %s1148_s11 }
 0x22d   : > { %v2997_v44 = vld [vmem:[%s3962_s5 + $0x78] sm:$0xff]  ;;  %v2996_v3 = vld [vmem:[%s3962_s5 + $0x70] sm:$0xff]  ;;  %v2983_v48 = vld [vmem:[%s3962_s5 + $0x8] sm:$0xff] }
 0x22e   : > { %v3001_v45 = vld [vmem:[%s3962_s5 + $0x98] sm:$0xff]  ;;  %v3000_v21 = vld [vmem:[%s3962_s5 + $0x90] sm:$0xff]  ;;  %v2995_v4 = vld [vmem:[%s3962_s5 + $0x68] sm:$0xff] }
 0x22f   : > { %3030 = vmatpush.bf16.msra.mxu1 %v2988_v60  ;;  %3031 = vmatpush.bf16.msra.mxu2 %v2988_v60  ;;  %v2999_v53 = vld [vmem:[%s3962_s5 + $0x88] sm:$0xff]  ;;  %v2990_v55 = vld [vmem:[%s3962_s5 + $0x40] sm:$0xff]  ;;  %v3009_v57 = vld [vmem:[%s3962_s5 + $0xd8] sm:$0xff] }
 0x230   : > { %3032 = vmatpush.bf16.msra.mxu3 %v2988_v60  ;;  %1252 = vmatpush.bf16.msra.mxu0 %v2988_v60  ;;  %v2607_v34 = vld [vmem:[%s3571_s9 + $0x11] sm:$0xff]  ;;  %v2608_v36 = vld [vmem:[%s3571_s9 + $0x19] sm:$0xff]  ;;  %v2605_v42 = vld [vmem:[%s3571_s9 + $0x1] sm:$0xff] }
 0x231   : > { %v2611_v52 = vld [vmem:[%s3571_s9 + $0x31] sm:$0xff]  ;;  %v3577_v31 = vld [vmem:[%s3571_s9 + $0x39] sm:$0xff]  ;;  %v1191_v40 = vpack.c.bf16 %v2608_v36, %v2607_v34  ;;  %v2606_v43 = vld [vmem:[%s3571_s9 + $0x9] sm:$0xff] }
 0x232   : > { %v3586_v1 = vld [vmem:[%s3571_s9 + $0x51] sm:$0xff]  ;;  %v3589_v39 = vld [vmem:[%s3571_s9 + $0x59] sm:$0xff]  ;;  %v1193_v41 = vpack.c.bf16 %v3577_v31, %v2611_v52  ;;  %v1190_v47 = vpack.c.bf16 %v2606_v43, %v2605_v42  ;;  %v2609_v58 = vld [vmem:[%s3571_s9 + $0x21] sm:$0xff] }
 0x233   : > { %3033 = vmatpush.bf16.msra.mxu1 %v2987_v29  ;;  %3034 = vmatpush.bf16.msra.mxu2 %v2987_v29  ;;  %v1195_v46 = vpack.c.bf16 %v3589_v39, %v3586_v1  ;;  %v2994_v56 = vld [vmem:[%s3962_s5 + $0x60] sm:$0xff]  ;;  %v2610_v63 = vld [vmem:[%s3571_s9 + $0x29] sm:$0xff]  ;;  %v3005_v50 = vld [vmem:[%s3962_s5 + $0xb8] sm:$0xff] }
 0x234   : > { %3035 = vmatpush.bf16.msra.mxu3 %v2987_v29  ;;  %1253 = vmatpush.bf16.msra.mxu0 %v2987_v29  ;;  %v2982_v61 = vld [vmem:[%s3962_s5] sm:$0xff]  ;;  %v3651_v6 = vld [vmem:[%s3571_s9 + $0x49] sm:$0xff]  ;;  %v3013_v7 = vld [vmem:[%s3962_s5 + $0xf8] sm:$0xff]  ;;  %v1192_v62 = vpack.c.bf16 %v2610_v63, %v2609_v58 }
 0x235   : > { %v3648_v2 = vld [vmem:[%s3571_s9 + $0x41] sm:$0xff]  ;;  %v3017_v8 = vld [vmem:[%s3962_s5 + $0x118] sm:$0xff]  ;;  %v3008_v16 = vld [vmem:[%s3962_s5 + $0xd0] sm:$0xff] }
 0x236   : > { %v2998_v5 = vld [vmem:[%s3962_s5 + $0x80] sm:$0xff]  ;;  %v1194_v22 = vpack.c.bf16 %v3651_v6, %v3648_v2  ;;  %v3012_v51 = vld [vmem:[%s3962_s5 + $0xf0] sm:$0xff]  ;;  %v1151_v18 = vld [vmem:[%s3571_s9 + $0x8] sm:$0xff] }
 0x237   : > { %3036 = vmatpush.bf16.msra.mxu1 %v2986_v30  ;;  %3037 = vmatpush.bf16.msra.mxu2 %v2986_v30  ;;  %v2711_v11 = vld [vmem:[%s3571_s9 + $0x1c] sm:$0xff]  ;;  %v2712_v10 = vld [vmem:[%s3571_s9 + $0x24] sm:$0xff]  ;;  %v3004_v17 = vld [vmem:[%s3962_s5 + $0xb0] sm:$0xff] }
 0x238   : > { %3038 = vmatpush.bf16.msra.mxu3 %v2986_v30  ;;  %1254 = vmatpush.bf16.msra.mxu0 %v2986_v30  ;;  %v2753_v12 = vld [vmem:[%s3571_s9 + $0x1d] sm:$0xff]  ;;  %v2754_v13 = vld [vmem:[%s3571_s9 + $0x25] sm:$0xff]  ;;  %v1503_v14 = vpack.c.bf16 %v2712_v10, %v2711_v11  ;;  %v2714_v24 = vld [vmem:[%s3571_s9 + $0x34] sm:$0xff] }
 0x239   : > { %v1625_v15 = vpack.c.bf16 %v2754_v13, %v2753_v12  ;;  %v1150_v0 = vld [vmem:[%s3571_s9] sm:$0xff]  ;;  %v2670_v19 = vld [vmem:[%s3571_s9 + $0xa] sm:$0xff]  ;;  %v2756_v9 = vld [vmem:[%s3571_s9 + $0x35] sm:$0xff] }
 0x23a   : > { %2642 = vmatmul.msk.bf16.vlgmr.msra.gmra.mxu1 %vm36_vm1, %v1191_v40  ;;  %2644 = vmatmul.msk.bf16.vlgmr.msra.gmra.mxu2 %vm36_vm1, %v1193_v41  ;;  %v2669_v23 = vld [vmem:[%s3571_s9 + $0x2] sm:$0xff]  ;;  %v2713_v20 = vld [vmem:[%s3571_s9 + $0x2c] sm:$0xff]  ;;  %v1162_v25 = vpack.c.bf16 %v1151_v18, %v1150_v0  ;;  %v1153_v60 = vld [vmem:[%s3571_s9 + $0x18] sm:$0xff] }
 0x23b   : > { %1442 = vmatpush.bf16.msrb.mxu2 %v2993_v37  ;;  %1332 = vmatpush.bf16.msrb.mxu1 %v2985_v38  ;;  %v1381_v26 = vpack.c.bf16 %v2670_v19, %v2669_v23  ;;  %v2755_v59 = vld [vmem:[%s3571_s9 + $0x2d] sm:$0xff]  ;;  %v1504_v27 = vpack.c.bf16 %v2714_v24, %v2713_v20  ;;  %v2672_v30 = vld [vmem:[%s3571_s9 + $0x1a] sm:$0xff]  ;;  %v2716_v36 = vld [vmem:[%s3571_s9 + $0x44] sm:$0xff] }
 0x23c   : > { %1564 = vmatpush.bf16.msrb.mxu3 %v2997_v44  ;;  %1686 = vmatpush.bf16.msrb.mxu0 %v3001_v45  ;;  %v1626_v28 = vpack.c.bf16 %v2756_v9, %v2755_v59  ;;  %v3016_v33 = vld [vmem:[%s3962_s5 + $0x110] sm:$0xff]  ;;  %v2715_v34 = vld [vmem:[%s3571_s9 + $0x3c] sm:$0xff]  ;;  %v2758_v40 = vld [vmem:[%s3571_s9 + $0x45] sm:$0xff] }
 0x23d   : > { %2646 = vmatmul.msk.bf16.vlgmr.msra.gmra.mxu3 %vm36_vm1, %v1195_v46  ;;  %2641 = vmatmul.msk.bf16.vlgmr.msra.gmra.mxu0 %vm36_vm1, %v1190_v47  ;;  %v1152_v35 = vld [vmem:[%s3571_s9 + $0x10] sm:$0xff]  ;;  %v2757_v38 = vld [vmem:[%s3571_s9 + $0x3d] sm:$0xff]  ;;  %v1505_v41 = vpack.c.bf16 %v2716_v36, %v2715_v34  ;;  %v3007_v43 = vld [vmem:[%s3962_s5 + $0xc8] sm:$0xff] }
 0x23e   : > { %v2671_v29 = vld [vmem:[%s3571_s9 + $0x12] sm:$0xff]  ;;  %v1163_v52 = vpack.c.bf16 %v1153_v60, %v1152_v35  ;;  %v1627_v42 = vpack.c.bf16 %v2758_v40, %v2757_v38  ;;  %v3011_v44 = vld [vmem:[%s3962_s5 + $0xe8] sm:$0xff]  ;;  %v1154_v46 = vld [vmem:[%s3571_s9 + $0x20] sm:$0xff] }
 0x23f   : > { %1443 = vmatpush.bf16.msrb.mxu2 %v2992_v32  ;;  %1333 = vmatpush.bf16.msrb.mxu1 %v2984_v54  ;;  %v1382_v37 = vpack.c.bf16 %v2672_v30, %v2671_v29  ;;  %v3003_v45 = vld [vmem:[%s3962_s5 + $0xa8] sm:$0xff]  ;;  %v3010_v58 = vld [vmem:[%s3962_s5 + $0xe0] sm:$0xff]  ;;  %v2722_v19 = vld [vmem:[%s3571_s9 + $0x74] sm:$0xff]  ;;  %v1991_v30 = vpack.c.bf16 %v3648_v2, %v3577_v31  ;;  %v1992_v31 = vpack.c.bf16 %v3586_v1, %v3651_v6 }
 0x240   : > { %1565 = vmatpush.bf16.msrb.mxu3 %v2996_v3  ;;  %1687 = vmatpush.bf16.msrb.mxu0 %v3000_v21  ;;  %v3015_v32 = vld [vmem:[%s3962_s5 + $0x108] sm:$0xff]  ;;  %v3002_v63 = vld [vmem:[%s3962_s5 + $0xa0] sm:$0xff]  ;;  %v2798_v1 = vld [vmem:[%s3571_s9 + $0x36] sm:$0xff] }
 0x241   : > { %v1155_v54 = vld [vmem:[%s3571_s9 + $0x28] sm:$0xff]  ;;  %v2719_v11 = vld [vmem:[%s3571_s9 + $0x5c] sm:$0xff] }
 0x242   : > { %v2673_v47 = vld [vmem:[%s3571_s9 + $0x22] sm:$0xff]  ;;  %v2674_v3 = vld [vmem:[%s3571_s9 + $0x2a] sm:$0xff]  ;;  %v2680_v35 = vld [vmem:[%s3571_s9 + $0x5a] sm:$0xff] }
 0x243   : > { %1444 = vmatpush.bf16.msrb.mxu2 %v2991_v49  ;;  %1334 = vmatpush.bf16.msrb.mxu1 %v2983_v48  ;;  %v2717_v21 = vld [vmem:[%s3571_s9 + $0x4c] sm:$0xff]  ;;  %v2718_v49 = vld [vmem:[%s3571_s9 + $0x54] sm:$0xff]  ;;  %v1164_v48 = vpack.c.bf16 %v1155_v54, %v1154_v46  ;;  %v2720_v10 = vld [vmem:[%s3571_s9 + $0x64] sm:$0xff] }
 0x244   : > { %1566 = vmatpush.bf16.msrb.mxu3 %v2995_v4  ;;  %1688 = vmatpush.bf16.msrb.mxu0 %v2999_v53  ;;  %v1383_v4 = vpack.c.bf16 %v2674_v3, %v2673_v47  ;;  %v2759_v53 = vld [vmem:[%s3571_s9 + $0x4d] sm:$0xff]  ;;  %v2761_v12 = vld [vmem:[%s3571_s9 + $0x5d] sm:$0xff]  ;;  %v2762_v13 = vld [vmem:[%s3571_s9 + $0x65] sm:$0xff] }
 0x245   : > { %v2677_v0 = vld [vmem:[%s3571_s9 + $0x42] sm:$0xff]  ;;  %v2678_v18 = vld [vmem:[%s3571_s9 + $0x4a] sm:$0xff] }
 0x246   : > { %v2721_v23 = vld [vmem:[%s3571_s9 + $0x6c] sm:$0xff]  ;;  %v1385_v24 = vpack.c.bf16 %v2678_v18, %v2677_v0  ;;  %v2795_v36 = vld [vmem:[%s3571_s9 + $0x1e] sm:$0xff] }
 0x247   : > { %1445 = vmatpush.bf16.msrb.mxu2 %v2990_v55  ;;  %1335 = vmatpush.bf16.msrb.mxu1 %v2982_v61  ;;  %v2760_v55 = vld [vmem:[%s3571_s9 + $0x55] sm:$0xff]  ;;  %v1508_v59 = vpack.c.bf16 %v2722_v19, %v2721_v23  ;;  %v2884_v46 = vld [vmem:[%s3571_s9 + $0x61] sm:$0xff] }
 0x248   : > { %1567 = vmatpush.bf16.msrb.mxu3 %v2994_v56  ;;  %1689 = vmatpush.bf16.msrb.mxu0 %v2998_v5  ;;  %v1506_v56 = vpack.c.bf16 %v2718_v49, %v2717_v21  ;;  %v1628_v61 = vpack.c.bf16 %v2760_v55, %v2759_v53  ;;  %v1157_v5 = vld [vmem:[%s3571_s9 + $0x38] sm:$0xff]  ;;  %v2926_v3 = vld [vmem:[%s3571_s9 + $0x62] sm:$0xff] }
 0x24a   : > { %2643 = vmatmul.msk.bf16.gmra.mxu1 %vm36_vm1, %v1192_v62  ;;  %2645 = vmatmul.msk.bf16.gmra.mxu2 %vm36_vm1, %v1194_v22 }
 0x24b   : > { %1930 = vmatpush.bf16.msra.mxu2 %v3009_v57  ;;  %1808 = vmatpush.bf16.msra.mxu1 %v3005_v50  ;;  %v3006_v57 = vld [vmem:[%s3962_s5 + $0xc0] sm:$0xff]  ;;  %v1156_v50 = vld [vmem:[%s3571_s9 + $0x30] sm:$0xff] }
 0x24c   : > { %2052 = vmatpush.bf16.msra.mxu3 %v3013_v7  ;;  %2174 = vmatpush.bf16.msra.mxu0 %v3017_v8  ;;  %v2675_v7 = vld [vmem:[%s3571_s9 + $0x32] sm:$0xff]  ;;  %v2676_v8 = vld [vmem:[%s3571_s9 + $0x3a] sm:$0xff]  ;;  %v1165_v62 = vpack.c.bf16 %v1157_v5, %v1156_v50 }
 0x24d   : > { %2747 = vmatmul.msk.bf16.vlgmr.msrb.gmra.mxu3 %vm36_vm1, %v1503_v14  ;;  %2789 = vmatmul.msk.bf16.vlgmr.msrb.gmra.mxu0 %vm36_vm1, %v1625_v15  ;;  %v1384_v22 = vpack.c.bf16 %v2676_v8, %v2675_v7  ;;  %v1507_v14 = vpack.c.bf16 %v2720_v10, %v2719_v11  ;;  %v1629_v15 = vpack.c.bf16 %v2762_v13, %v2761_v12  ;;  %v2886_v7 = vld [vmem:[%s3571_s9 + $0x71] sm:$0xff] }
 0x24e   : > { %v2113_v34 = vpack.c.bf16 %v2677_v0, %v2676_v8  ;;  %v2927_v10 = vld [vmem:[%s3571_s9 + $0x6a] sm:$0xff] }
 0x24f   : > { %1931 = vmatpush.bf16.msra.mxu2 %v3008_v16  ;;  %1809 = vmatpush.bf16.msra.mxu1 %v3004_v17  ;;  %v3014_v16 = vld [vmem:[%s3962_s5 + $0x100] sm:$0xff]  ;;  %v1159_v17 = vld [vmem:[%s3571_s9 + $0x48] sm:$0xff] }
 0x250   : > { %2053 = vmatpush.bf16.msra.mxu3 %v3012_v51  ;;  %2175 = vmatpush.bf16.msra.mxu0 %v3016_v33  ;;  %v1158_v51 = vld [vmem:[%s3571_s9 + $0x40] sm:$0xff]  ;;  %v2679_v33 = vld [vmem:[%s3571_s9 + $0x52] sm:$0xff] }
 0x251   : > { %v1166_v20 = vpack.c.bf16 %v1159_v17, %v1158_v51  ;;  %v1386_v29 = vpack.c.bf16 %v2680_v35, %v2679_v33  ;;  %v1869_v38 = vpack.c.bf16 %v1158_v51, %v1157_v5  ;;  %v2114_v2 = vpack.c.bf16 %v2679_v33, %v2678_v18  ;;  %v2885_v5 = vld [vmem:[%s3571_s9 + $0x69] sm:$0xff]  ;;  %v2888_v33 = vld [vmem:[%s3571_s9 + $0x81] sm:$0xff] }
 0x253   : > { %1932 = vmatpush.bf16.msra.mxu2 %v3007_v43  ;;  %1810 = vmatpush.bf16.msra.mxu1 %v3003_v45 }
 0x254   : > { %2054 = vmatpush.bf16.msra.mxu3 %v3011_v44  ;;  %2176 = vmatpush.bf16.msra.mxu0 %v3015_v32  ;;  %v2797_v32 = vld [vmem:[%s3571_s9 + $0x2e] sm:$0xff] }
 0x255   : > { %v1748_v54 = vpack.c.bf16 %v2798_v1, %v2797_v32 }
 0x257   : > { %1933 = vmatpush.bf16.msra.mxu2 %v3006_v57  ;;  %1811 = vmatpush.bf16.msra.mxu1 %v3002_v63  ;;  %v2842_v63 = vld [vmem:[%s3571_s9 + $0x60] sm:$0xff] }
 0x258   : > { %2055 = vmatpush.bf16.msra.mxu3 %v3010_v58  ;;  %2177 = vmatpush.bf16.msra.mxu0 %v3014_v16  ;;  %v2800_v58 = vld [vmem:[%s3571_s9 + $0x46] sm:$0xff] }
 0x25a   : > { %2663 = vmatmul.msk.bf16.vlgmr.msrb.gmra.mxu1 %vm36_vm1, %v1162_v25  ;;  %2705 = vmatmul.msk.bf16.vlgmr.msrb.gmra.mxu2 %vm36_vm1, %v1381_v26  ;;  %v2763_v25 = vld [vmem:[%s3571_s9 + $0x6d] sm:$0xff]  ;;  %v2764_v26 = vld [vmem:[%s3571_s9 + $0x75] sm:$0xff] }
 0x25b   : > { %v1630_v9 = vpack.c.bf16 %v2764_v26, %v2763_v25  ;;  %v2802_v26 = vld [vmem:[%s3571_s9 + $0x56] sm:$0xff] }
 0x25d   : > { %2748 = vmatmul.msk.bf16.gmra.mxu3 %vm36_vm1, %v1504_v27  ;;  %2790 = vmatmul.msk.bf16.gmra.mxu0 %vm36_vm1, %v1626_v28  ;;  %v1160_v27 = vld [vmem:[%s3571_s9 + $0x50] sm:$0xff]  ;;  %v3770_v28 = vld [vmem:[%s3571_s9 + $0x58] sm:$0xff] }
 0x25e   : > { %v1167_v60 = vpack.c.bf16 %v3770_v28, %v1160_v27  ;;  %v1870_v47 = vpack.c.bf16 %v1160_v27, %v1159_v17  ;;  %v1871_v11 = vpack.c.bf16 %v2842_v63, %v3770_v28  ;;  %v2887_v28 = vld [vmem:[%s3571_s9 + $0x79] sm:$0xff]  ;;  %v2890_v63 = vld [vmem:[%s3571_s9 + $0x91] sm:$0xff] }
 0x26a   : > { %2664 = vmatmul.msk.bf16.gmra.mxu1 %vm36_vm1, %v1163_v52  ;;  %2706 = vmatmul.msk.bf16.gmra.mxu2 %vm36_vm1, %v1382_v37  ;;  %v2796_v52 = vld [vmem:[%s3571_s9 + $0x26] sm:$0xff] }
 0x26b   : > { %v1747_v37 = vpack.c.bf16 %v2796_v52, %v2795_v36 }
 0x26d   : > { %2749 = vmatmul.msk.bf16.gmra.mxu3 %vm36_vm1, %v1505_v41  ;;  %2791 = vmatmul.msk.bf16.gmra.mxu0 %vm36_vm1, %v1627_v42 }
 0x27a   : > { %2665 = vmatmul.msk.bf16.gmra.mxu1 %vm36_vm1, %v1164_v48  ;;  %2707 = vmatmul.msk.bf16.gmra.mxu2 %vm36_vm1, %v1383_v4  ;;  %v1993_v48 = vpack.c.bf16 %v2884_v46, %v3589_v39  ;;  %v2115_v4 = vpack.c.bf16 %v2926_v3, %v2680_v35  ;;  %v2799_v39 = vld [vmem:[%s3571_s9 + $0x3e] sm:$0xff] }
 0x27b   : > { %v1749_v8 = vpack.c.bf16 %v2800_v58, %v2799_v39  ;;  %v2803_v3 = vld [vmem:[%s3571_s9 + $0x5e] sm:$0xff]  ;;  %v2889_v58 = vld [vmem:[%s3571_s9 + $0x89] sm:$0xff] }
 0x27d   : > { %2750 = vmatmul.msk.bf16.gmra.mxu3 %vm36_vm1, %v1506_v56  ;;  %2792 = vmatmul.msk.bf16.gmra.mxu0 %vm36_vm1, %v1628_v61 }
 0x28a   : > { %2666 = vmatmul.msk.bf16.gmra.mxu1 %vm36_vm1, %v1165_v62  ;;  %2708 = vmatmul.msk.bf16.gmra.mxu2 %vm36_vm1, %v1384_v22  ;;  %v2928_v62 = vld [vmem:[%s3571_s9 + $0x72] sm:$0xff] }
 0x28d   : > { %2751 = vmatmul.msk.bf16.gmra.mxu3 %vm36_vm1, %v1507_v14  ;;  %2793 = vmatmul.msk.bf16.gmra.mxu0 %vm36_vm1, %v1629_v15  ;;  %v1994_v14 = vpack.c.bf16 %v2886_v7, %v2885_v5  ;;  %v2116_v15 = vpack.c.bf16 %v2928_v62, %v2927_v10  ;;  %v2932_v10 = vld [vmem:[%s3571_s9 + $0x92] sm:$0xff] }
 0x29a   : > { %2667 = vmatmul.msk.bf16.gmra.mxu1 %vm36_vm1, %v1166_v20  ;;  %2709 = vmatmul.msk.bf16.gmra.mxu2 %vm36_vm1, %v1385_v24  ;;  %v2801_v20 = vld [vmem:[%s3571_s9 + $0x4e] sm:$0xff] }
 0x29d   : > { %2752 = vmatmul.msk.bf16.gmra.mxu3 %vm36_vm1, %v1508_v59  ;;  %2794 = vmatmul.msk.bf16.gmra.mxu0 %vm36_vm1, %v1630_v9  ;;  %v2843_v59 = vld [vmem:[%s3571_s9 + $0x68] sm:$0xff]  ;;  %v2844_v9 = vld [vmem:[%s3571_s9 + $0x70] sm:$0xff] }
 0x2aa   : > { %2668 = vmatmul.msk.bf16.gmra.mxu1 %vm36_vm1, %v1167_v60  ;;  %2710 = vmatmul.msk.bf16.gmra.mxu2 %vm36_vm1, %v1386_v29  ;;  %v1750_v60 = vpack.c.bf16 %v2802_v26, %v2801_v20  ;;  %v1872_v29 = vpack.c.bf16 %v2844_v9, %v2843_v59  ;;  %v2806_v59 = vld [vmem:[%s3571_s9 + $0x76] sm:$0xff]  ;;  %v2847_v9 = vld [vmem:[%s3571_s9 + $0x88] sm:$0xff] }
 0x2ad   : > { %2915 = vmatmul.msk.bf16.vlgmr.msra.gmra.mxu3 %vm36_vm1, %v1991_v30  ;;  %2957 = vmatmul.msk.bf16.vlgmr.msra.gmra.mxu0 %vm36_vm1, %v2113_v34  ;;  %v2929_v30 = vld [vmem:[%s3571_s9 + $0x7a] sm:$0xff]  ;;  %v2930_v34 = vld [vmem:[%s3571_s9 + $0x82] sm:$0xff] }
 0x2b7   : > { %v3783_v40 = vpop.f32.mrf.mxu1 }
 0x2ba   : > { %2831 = vmatmul.msk.bf16.vlgmr.msra.gmra.mxu1 %vm36_vm1, %v1747_v37  ;;  %2873 = vmatmul.msk.bf16.vlgmr.msra.gmra.mxu2 %vm36_vm1, %v1869_v38  ;;  %v1256_v41 = vpop.f32.mrf.mxu0 }
 0x2bd   : > { %2916 = vmatmul.msk.bf16.gmra.mxu3 %vm36_vm1, %v1992_v31  ;;  %v3790_v42 = vpop.f32.mrf.mxu2  ;;  %2958 = vmatmul.msk.bf16.gmra.mxu0 %vm36_vm1, %v2114_v2  ;;  %v1995_v31 = vpack.c.bf16 %v2888_v33, %v2887_v28  ;;  %v2117_v2 = vpack.c.bf16 %v2930_v34, %v2929_v30 }
 0x2bf   : > { %v3793_v43 = vpop.f32.mrf.mxu1 }
 0x2c0   : > { %v3795_v44 = vpop.f32.mrf.mxu3 }
 0x2c2   : > { %v1258_v45 = vpop.f32.mrf.mxu0 }
 0x2c5   : > { %v3799_v6 = vpop.f32.mrf.mxu2 }
 0x2c7   : > { %v3803_v21 = vpop.f32.mrf.mxu1 }
 0x2c8   : > { %v3805_v49 = vpop.f32.mrf.mxu3 }
 0x2ca   : > { %2832 = vmatmul.msk.bf16.gmra.mxu1 %vm36_vm1, %v1748_v54  ;;  %2874 = vmatmul.msk.bf16.gmra.mxu2 %vm36_vm1, %v1870_v47  ;;  %v1691_v53 = vpop.f32.mrf.mxu0 }
 0x2cd   : > { %2917 = vmatmul.msk.bf16.gmra.mxu3 %vm36_vm1, %v1993_v48  ;;  %v3811_v55 = vpop.f32.mrf.mxu2  ;;  %2959 = vmatmul.msk.bf16.gmra.mxu0 %vm36_vm1, %v2115_v4 }
 0x2cf   : > { %v3814_v56 = vpop.f32.mrf.mxu1 }
 0x2d0   : > { %v1569_v61 = vpop.f32.mrf.mxu3 }
 0x2d2   : > { %v1693_v57 = vpop.f32.mrf.mxu0 }
 0x2d5   : > { %v3819_v50 = vpop.f32.mrf.mxu2 }
 0x2d7   : > { %v1337_v22 = vpop.f32.mrf.mxu1 }
 0x2d8   : > { %v1571_v12 = vpop.f32.mrf.mxu3  ;;  %v1338_v13 = vadd.f32 %v1337_v22, %v1256_v41 }
 0x2da   : > { %2833 = vmatmul.msk.bf16.gmra.mxu1 %vm36_vm1, %v1749_v8  ;;  %2875 = vmatmul.msk.bf16.gmra.mxu2 %vm36_vm1, %v1871_v11  ;;  %v1696_v16 = vpop.f32.mrf.mxu0  ;;  %v2931_v11 = vld [vmem:[%s3571_s9 + $0x8a] sm:$0xff] }
 0x2dd   : > { %2918 = vmatmul.msk.bf16.gmra.mxu3 %vm36_vm1, %v1994_v14  ;;  %v1447_v51 = vpop.f32.mrf.mxu2  ;;  %2960 = vmatmul.msk.bf16.gmra.mxu0 %vm36_vm1, %v2116_v15  ;;  %v2118_v14 = vpack.c.bf16 %v2932_v10, %v2931_v11 }
 0x2de   : > { %v1477_v17 = vadd.f32 %v1447_v51, %v1338_v13  ;;  %v1996_v13 = vpack.c.bf16 %v2890_v63, %v2889_v58 }
 0x2df   : > { %v1339_v0 = vpop.f32.mrf.mxu1 }
 0x2e0   : > { %v1574_v18 = vpop.f32.mrf.mxu3  ;;  %v1599_v23 = vadd.f32 %v1569_v61, %v1477_v17  ;;  %v1340_v19 = vadd.f32 %v1339_v0, %v1258_v45  ;;  %v2845_v61 = vld [vmem:[%s3571_s9 + $0x78] sm:$0xff] }
 0x2e2   : > { %v1698_v24 = vpop.f32.mrf.mxu0  ;;  %v3831_v25 = vadd.f32 %v1691_v53, %v1599_v23  ;;  %v2804_v53 = vld [vmem:[%s3571_s9 + $0x66] sm:$0xff] }
 0x2e3   : > { %v1751_v7 = vpack.c.bf16 %v2804_v53, %v2803_v3 }
 0x2e5   : > { %v1449_v27 = vpop.f32.mrf.mxu2 }
 0x2e6   : > { %v1478_v35 = vadd.f32 %v1449_v27, %v1340_v19  ;;  %v2805_v19 = vld [vmem:[%s3571_s9 + $0x6e] sm:$0xff] }
 0x2e7   : > { %v1342_v36 = vpop.f32.mrf.mxu1  ;;  %v2848_v27 = vld [vmem:[%s3571_s9 + $0x90] sm:$0xff]  ;;  %v1752_v33 = vpack.c.bf16 %v2806_v59, %v2805_v19 }
 0x2e8   : > { %v1576_v52 = vpop.f32.mrf.mxu3  ;;  %v1600_v37 = vadd.f32 %v1571_v12, %v1478_v35  ;;  %v1343_v38 = vadd.f32 %v1342_v36, %v3783_v40  ;;  %v1874_v35 = vpack.c.bf16 %v2848_v27, %v2847_v9 }
 0x2ea   : > { %2834 = vmatmul.msk.bf16.gmra.mxu1 %vm36_vm1, %v1750_v60  ;;  %2876 = vmatmul.msk.bf16.gmra.mxu2 %vm36_vm1, %v1872_v29  ;;  %v1701_v41 = vpop.f32.mrf.mxu0  ;;  %v3843_v45 = vadd.f32 %v1693_v57, %v1600_v37  ;;  %v2846_v57 = vld [vmem:[%s3571_s9 + $0x80] sm:$0xff] }
 0x2eb   : > { %v1873_v8 = vpack.c.bf16 %v2846_v57, %v2845_v61 }
 0x2ed   : > { %2919 = vmatmul.msk.bf16.gmra.mxu3 %vm36_vm1, %v1995_v31  ;;  %v1452_v32 = vpop.f32.mrf.mxu2  ;;  %2961 = vmatmul.msk.bf16.gmra.mxu0 %vm36_vm1, %v2117_v2 }
 0x2ee   : > { %v1479_v40 = vadd.f32 %v1452_v32, %v1343_v38 }
 0x2ef   : > { %v1344_v1 = vpop.f32.mrf.mxu1 }
 0x2f0   : > { %v1579_v46 = vpop.f32.mrf.mxu3  ;;  %v1601_v54 = vadd.f32 %v1574_v18, %v1479_v40  ;;  %v1345_v47 = vadd.f32 %v1344_v1, %v3793_v43 }
 0x2f2   : > { %v1703_v48 = vpop.f32.mrf.mxu0  ;;  %v3849_v4 = vadd.f32 %v1696_v16, %v1601_v54 }
 0x2f5   : > { %v1454_v39 = vpop.f32.mrf.mxu2 }
 0x2f6   : > { %v1480_v5 = vadd.f32 %v1454_v39, %v1345_v47 }
 0x2f7   : > { %v1347_v62 = vpop.f32.mrf.mxu1 }
 0x2f8   : > { %v1581_v22 = vpop.f32.mrf.mxu3  ;;  %v1602_v12 = vadd.f32 %v1576_v52, %v1480_v5  ;;  %v1348_v43 = vadd.f32 %v1347_v62, %v3803_v21 }
 0x2fa   : > { %2835 = vmatmul.msk.bf16.gmra.mxu1 %vm36_vm1, %v1751_v7  ;;  %2877 = vmatmul.msk.bf16.gmra.mxu2 %vm36_vm1, %v1873_v8  ;;  %v1706_v15 = vpop.f32.mrf.mxu0  ;;  %v3861_v16 = vadd.f32 %v1698_v24, %v1602_v12 }
 0x2fd   : > { %2920 = vmatmul.msk.bf16.gmra.mxu3 %vm36_vm1, %v1996_v13  ;;  %v1457_v51 = vpop.f32.mrf.mxu2  ;;  %2962 = vmatmul.msk.bf16.gmra.mxu0 %vm36_vm1, %v2118_v14 }
 0x2fe   : > { %v1481_v17 = vadd.f32 %v1457_v51, %v1348_v43 }
 0x2ff   : > { %v1349_v0 = vpop.f32.mrf.mxu1 }
 0x300   : > { %v1584_v21 = vpop.f32.mrf.mxu3  ;;  %v1603_v18 = vadd.f32 %v1579_v46, %v1481_v17  ;;  %v1350_v23 = vadd.f32 %v1349_v0, %v3814_v56 }
 0x302   : > { %v1708_v20 = vpop.f32.mrf.mxu0  ;;  %v3867_v26 = vadd.f32 %v1701_v41, %v1603_v18 }
 0x305   : > { %v1459_v24 = vpop.f32.mrf.mxu2 }
 0x306   : > { %v1482_v28 = vadd.f32 %v1459_v24, %v1350_v23 }
 0x307   : > { %v1352_v60 = vpop.f32.mrf.mxu1 }
 0x308   : > { %v1586_v29 = vpop.f32.mrf.mxu3  ;;  %v1604_v30 = vadd.f32 %v1581_v22, %v1482_v28  ;;  %v1353_v36 = vadd.f32 %v1352_v60, %v3790_v42 }
 0x30a   : > { %2836 = vmatmul.msk.bf16.gmra.mxu1 %vm36_vm1, %v1752_v33  ;;  %2878 = vmatmul.msk.bf16.gmra.mxu2 %vm36_vm1, %v1874_v35  ;;  %v1711_v34 = vpop.f32.mrf.mxu0  ;;  %v3874_v56 = vadd.f32 %v1703_v48, %v1604_v30 }
 0x30d   : > { %v1462_v52 = vpop.f32.mrf.mxu2 }
 0x30e   : > { %v1483_v37 = vadd.f32 %v1462_v52, %v1353_v36 }
 0x30f   : > { %v1354_v38 = vpop.f32.mrf.mxu1 }
 0x310   : > { %v1589_v31 = vpop.f32.mrf.mxu3  ;;  %v1605_v2 = vadd.f32 %v1584_v21, %v1483_v37  ;;  %v1355_v40 = vadd.f32 %v1354_v38, %v3799_v6 }
 0x312   : > { %v1713_v41 = vpop.f32.mrf.mxu0  ;;  %v3877_v32 = vadd.f32 %v1706_v15, %v1605_v2 }
 0x315   : > { %v1464_v1 = vpop.f32.mrf.mxu2 }
 0x316   : > { %v1484_v46 = vadd.f32 %v1464_v1, %v1355_v40 }
 0x317   : > { %v1357_v54 = vpop.f32.mrf.mxu1 }
 0x318   : > { %v1591_v47 = vpop.f32.mrf.mxu3  ;;  %v1606_v3 = vadd.f32 %v1586_v29, %v1484_v46  ;;  %v1358_v42 = vadd.f32 %v1357_v54, %v3811_v55 }
 0x31a   : > { %v1716_v53 = vpop.f32.mrf.mxu0  ;;  %v3880_v48 = vadd.f32 %v1708_v20, %v1606_v3 }
 0x31d   : > { %v1467_v61 = vpop.f32.mrf.mxu2 }
 0x31e   : > { %v1485_v57 = vadd.f32 %v1467_v61, %v1358_v42 }
 0x31f   : > { %v1359_v39 = vpop.f32.mrf.mxu1 }
 0x320   : > { %v1594_v58 = vpop.f32.mrf.mxu3  ;;  %v1607_v63 = vadd.f32 %v1589_v31, %v1485_v57  ;;  %v1360_v6 = vadd.f32 %v1359_v39, %v3819_v50 }
 0x322   : > { %v1718_v5 = vpop.f32.mrf.mxu0  ;;  %v3883_v7 = vadd.f32 %v1711_v34, %v1607_v63 }
 0x325   : > { %v1469_v8 = vpop.f32.mrf.mxu2 }
 0x326   : > { %v1486_v11 = vadd.f32 %v1469_v8, %v1360_v6 }
 0x327   : > { %v1362_v10 = vpop.f32.mrf.mxu1 }
 0x328   : > { %v1596_v62 = vpop.f32.mrf.mxu3  ;;  %v1608_v22 = vadd.f32 %v1591_v47, %v1486_v11  ;;  %v1363_v55 = vadd.f32 %v1362_v10, %v3795_v44 }
 0x32a   : > { %v2179_v12 = vpop.f32.mrf.mxu0  ;;  %v3886_v43 = vadd.f32 %v1713_v41, %v1608_v22 }
 0x32d   : > { %v1472_v13 = vpop.f32.mrf.mxu2 }
 0x32e   : > { %v1487_v14 = vadd.f32 %v1472_v13, %v1363_v55 }
 0x32f   : > { %v1364_v15 = vpop.f32.mrf.mxu1 }
 0x330   : > { %v2057_v51 = vpop.f32.mrf.mxu3  ;;  %v1609_v17 = vadd.f32 %v1594_v58, %v1487_v14  ;;  %v1365_v21 = vadd.f32 %v1364_v15, %v3805_v49  ;;  %v3898_v49 = vld [vmem:[%s3963_s6] ss:$0 sm:$0xff] }
 0x332   : > { %v3889_v0 = vadd.f32 %v1716_v53, %v1609_v17  ;;  %v2181_v50 = vpop.f32.mrf.mxu0 }
 0x335   : > { %v1474_v18 = vpop.f32.mrf.mxu2 }
 0x336   : > { %v1488_v23 = vadd.f32 %v1474_v18, %v1365_v21 }
 0x337   : > { %v1813_v19 = vpop.f32.mrf.mxu1 }
 0x338   : > { %v2059_v20 = vpop.f32.mrf.mxu3  ;;  %v1610_v59 = vadd.f32 %v1596_v62, %v1488_v23  ;;  %v1843_v44 = vadd.f32 %v1813_v19, %v3831_v25 }
 0x33a   : > { %v3892_v9 = vadd.f32 %v1718_v5, %v1610_v59  ;;  %v2184_v28 = vpop.f32.mrf.mxu0 }
 0x33d   : > { %v1935_v27 = vpop.f32.mrf.mxu2 }
 0x33e   : > { %v1965_v24 = vadd.f32 %v1935_v27, %v1843_v44 }
 0x33f   : > { %v1815_v33 = vpop.f32.mrf.mxu1 }
 0x340   : > { %v2062_v35 = vpop.f32.mrf.mxu3  ;;  %v2087_v60 = vadd.f32 %v2057_v51, %v1965_v24  ;;  %v1844_v34 = vadd.f32 %v1815_v33, %v3843_v45 }
 0x342   : > { %v2209_v29 = vadd.f32 %v2179_v12, %v2087_v60  ;;  %v2186_v2 = vpop.f32.mrf.mxu0 }
 0x344   : > { %v2225_v30 = vadd.f32 %v3898_v49, %v2209_v29 }
 0x345   : > { %v1937_v25 = vpop.f32.mrf.mxu2 }
 0x346   : > { %v2237_v36 = vmax.f32 %v2225_v30, 0.0  ;;  %v1966_v52 = vadd.f32 %v1937_v25, %v1844_v34 }
 0x347   : > { %v1818_v37 = vpop.f32.mrf.mxu1 }
 0x348   : > { %v2064_v38 = vpop.f32.mrf.mxu3  ;;  %2250 = vst.msk [vmem:[%s3907_s26] sm:$0xff] %vm36_vm1, %v2237_v36  ;;  %v2088_v31 = vadd.f32 %v2059_v20, %v1966_v52  ;;  %v1845_v40 = vadd.f32 %v1818_v37, %v3849_v4 }
 0x34a   : > { %v2210_v41 = vadd.f32 %v2181_v50, %v2088_v31  ;;  %v2189_v61 = vpop.f32.mrf.mxu0 }
 0x34c   : > { %v2226_v45 = vadd.f32 %v3898_v49, %v2210_v41 }
 0x34d   : > { %v1940_v1 = vpop.f32.mrf.mxu2 }
 0x34e   : > { %v2238_v46 = vmax.f32 %v2226_v45, 0.0  ;;  %v1967_v54 = vadd.f32 %v1940_v1, %v1845_v40 }
 0x34f   : > { %v1820_v47 = vpop.f32.mrf.mxu1 }
 0x350   : > { %2251 = vst.msk [vmem:[%s3907_s26 + $0x8] sm:$0xff] %vm36_vm1, %v2238_v46  ;;  %v2089_v3 = vadd.f32 %v2062_v35, %v1967_v54  ;;  %v2067_v53 = vpop.f32.mrf.mxu3  ;;  %v1846_v39 = vadd.f32 %v1820_v47, %v3861_v16 }
 0x352   : > { %v2211_v42 = vadd.f32 %v2184_v28, %v2089_v3  ;;  %v2191_v12 = vpop.f32.mrf.mxu0 }
 0x354   : > { %v2227_v57 = vadd.f32 %v3898_v49, %v2211_v42 }
 0x355   : > { %v1942_v58 = vpop.f32.mrf.mxu2 }
 0x356   : > { %v2239_v63 = vmax.f32 %v2227_v57, 0.0  ;;  %v1968_v5 = vadd.f32 %v1942_v58, %v1846_v39 }
 0x357   : > { %v1823_v4 = vpop.f32.mrf.mxu1 }
 0x358   : > { %2252 = vst.msk [vmem:[%s3907_s26 + $0x10] sm:$0xff] %vm36_vm1, %v2239_v63  ;;  %v2090_v6 = vadd.f32 %v2064_v38, %v1968_v5  ;;  %v2069_v11 = vpop.f32.mrf.mxu3  ;;  %v1847_v62 = vadd.f32 %v1823_v4, %v3867_v26 }
 0x35a   : > { %v2212_v8 = vadd.f32 %v2186_v2, %v2090_v6  ;;  %v2194_v19 = vpop.f32.mrf.mxu0 }
 0x35c   : > { %v2228_v10 = vadd.f32 %v3898_v49, %v2212_v8 }
 0x35d   : > { %v1945_v22 = vpop.f32.mrf.mxu2 }
 0x35e   : > { %v2240_v55 = vmax.f32 %v2228_v10, 0.0  ;;  %v1969_v13 = vadd.f32 %v1945_v22, %v1847_v62 }
 0x35f   : > { %v1825_v16 = vpop.f32.mrf.mxu1 }
 0x360   : > { %2253 = vst.msk [vmem:[%s3907_s26 + $0x18] sm:$0xff] %vm36_vm1, %v2240_v55  ;;  %v2091_v14 = vadd.f32 %v2067_v53, %v1969_v13  ;;  %v1848_v17 = vadd.f32 %v1825_v16, %v3874_v56  ;;  %v2072_v50 = vpop.f32.mrf.mxu3 }
 0x362   : > { %v2213_v15 = vadd.f32 %v2189_v61, %v2091_v14  ;;  %v2196_v29 = vpop.f32.mrf.mxu0 }
 0x364   : > { %v2229_v51 = vadd.f32 %v3898_v49, %v2213_v15 }
 0x365   : > { %v1947_v21 = vpop.f32.mrf.mxu2 }
 0x366   : > { %v2241_v18 = vmax.f32 %v2229_v51, 0.0  ;;  %v1970_v23 = vadd.f32 %v1947_v21, %v1848_v17 }
 0x367   : > { %v1828_v26 = vpop.f32.mrf.mxu1 }
 0x368   : > { %2254 = vst.msk [vmem:[%s3907_s26 + $0x20] sm:$0xff] %vm36_vm1, %v2241_v18  ;;  %v2092_v20 = vadd.f32 %v2069_v11, %v1970_v23  ;;  %v1849_v27 = vadd.f32 %v1828_v26, %v3877_v32  ;;  %v2074_v35 = vpop.f32.mrf.mxu3 }
 0x36a   : > { %v2214_v59 = vadd.f32 %v2191_v12, %v2092_v20  ;;  %v2199_v41 = vpop.f32.mrf.mxu0 }
 0x36c   : > { %v2230_v44 = vadd.f32 %v3898_v49, %v2214_v59 }
 0x36d   : > { %v1950_v24 = vpop.f32.mrf.mxu2 }
 0x36e   : > { %v2242_v28 = vmax.f32 %v2230_v44, 0.0  ;;  %v1971_v33 = vadd.f32 %v1950_v24, %v1849_v27 }
 0x36f   : > { %v1830_v56 = vpop.f32.mrf.mxu1 }
 0x370   : > { %2255 = vst.msk [vmem:[%s3907_s26 + $0x28] sm:$0xff] %vm36_vm1, %v2242_v28  ;;  %v2093_v60 = vadd.f32 %v2072_v50, %v1971_v33  ;;  %v1850_v25 = vadd.f32 %v1830_v56, %v3880_v48  ;;  %v2077_v31 = vpop.f32.mrf.mxu3 }
 0x372   : > { %v2215_v30 = vadd.f32 %v2194_v19, %v2093_v60  ;;  %v2201_v57 = vpop.f32.mrf.mxu0 }
 0x374   : > { %v2231_v34 = vadd.f32 %v3898_v49, %v2215_v30 }
 0x375   : > { %v1952_v36 = vpop.f32.mrf.mxu2 }
 0x376   : > { %v2243_v52 = vmax.f32 %v2231_v34, 0.0  ;;  %v1972_v37 = vadd.f32 %v1952_v36, %v1850_v25 }
 0x377   : > { %v1833_v32 = vpop.f32.mrf.mxu1 }
 0x378   : > { %2256 = vst.msk [vmem:[%s3907_s26 + $0x30] sm:$0xff] %vm36_vm1, %v2243_v52  ;;  %v2094_v38 = vadd.f32 %v2074_v35, %v1972_v37  ;;  %v1851_v40 = vadd.f32 %v1833_v32, %v3883_v7  ;;  %v2079_v53 = vpop.f32.mrf.mxu3 }
 0x37a   : > { %v2216_v2 = vadd.f32 %v2196_v29, %v2094_v38 }
 0x37c   : > { %v2232_v45 = vadd.f32 %v3898_v49, %v2216_v2 }
 0x37d   : > { %v1955_v1 = vpop.f32.mrf.mxu2 }
 0x37e   : > { %v2244_v46 = vmax.f32 %v2232_v45, 0.0  ;;  %v1973_v54 = vadd.f32 %v1955_v1, %v1851_v40 }
 0x37f   : > { %v1835_v48 = vpop.f32.mrf.mxu1 }
 0x380   : > { %2257 = vst.msk [vmem:[%s3907_s26 + $0x38] sm:$0xff] %vm36_vm1, %v2244_v46  ;;  %v2095_v47 = vadd.f32 %v2077_v31, %v1973_v54  ;;  %v1852_v61 = vadd.f32 %v1835_v48, %v3886_v43  ;;  %v2082_v11 = vpop.f32.mrf.mxu3  ;;  %v2204_v43 = vpop.f32.mrf.mxu0 }
 0x382   : > { %v2217_v3 = vadd.f32 %v2199_v41, %v2095_v47 }
 0x384   : > { %v2233_v42 = vadd.f32 %v3898_v49, %v2217_v3 }
 0x385   : > { %v1957_v39 = vpop.f32.mrf.mxu2 }
 0x386   : > { %v2245_v58 = vmax.f32 %v2233_v42, 0.0  ;;  %v1974_v63 = vadd.f32 %v1957_v39, %v1852_v61 }
 0x387   : > { %v1838_v7 = vpop.f32.mrf.mxu1 }
 0x388   : > { %2258 = vst.msk [vmem:[%s3907_s26 + $0x40] sm:$0xff] %vm36_vm1, %v2245_v58  ;;  %v2096_v5 = vadd.f32 %v2079_v53, %v1974_v63  ;;  %v1853_v8 = vadd.f32 %v1838_v7, %v3889_v0  ;;  %v2084_v0 = vpop.f32.mrf.mxu3  ;;  %v2206_v50 = vpop.f32.mrf.mxu0 }
 0x38a   : > { %v2218_v4 = vadd.f32 %v2201_v57, %v2096_v5 }
 0x38c   : > { %v2234_v6 = vadd.f32 %v3898_v49, %v2218_v4 }
 0x38d   : > { %v1960_v10 = vpop.f32.mrf.mxu2 }
 0x38e   : > { %v2246_v62 = vmax.f32 %v2234_v6, 0.0  ;;  %v1975_v22 = vadd.f32 %v1960_v10, %v1853_v8 }
 0x38f   : > { %v1840_v55 = vpop.f32.mrf.mxu1 }
 0x390   : > { %2259 = vst.msk [vmem:[%s3907_s26 + $0x48] sm:$0xff] %vm36_vm1, %v2246_v62  ;;  %v2097_v12 = vadd.f32 %v2082_v11, %v1975_v22  ;;  %v1854_v14 = vadd.f32 %v1840_v55, %v3892_v9 }
 0x392   : > { %v2219_v13 = vadd.f32 %v2204_v43, %v2097_v12 }
 0x394   : > { %v2235_v16 = vadd.f32 %v3898_v49, %v2219_v13 }
 0x395   : > { %v1962_v15 = vpop.f32.mrf.mxu2 }
 0x396   : > { %v2247_v51 = vmax.f32 %v2235_v16, 0.0  ;;  %v1976_v17 = vadd.f32 %v1962_v15, %v1854_v14 }
 0x398   : > { %2260 = vst.msk [vmem:[%s3907_s26 + $0x50] sm:$0xff] %vm36_vm1, %v2247_v51  ;;  %v2098_v21 = vadd.f32 %v2084_v0, %v1976_v17 }
 0x39a   : > { %v2220_v18 = vadd.f32 %v2206_v50, %v2098_v21 }
 0x39c   : > { %v2236_v23 = vadd.f32 %v3898_v49, %v2220_v18  ;;  %1146 = sbr.rel (!%p1144_p2) target bundleno = 554 (0x22a), region = 129 }
 0x39e   : > { %v2248_v26 = vmax.f32 %v2236_v23, 0.0 }
 0x3a0   : > { %2261 = vst.msk [vmem:[%s3907_s26 + $0x58] sm:$0xff] %vm36_vm1, %v2248_v26 }

</bundles_post_ra>
